<compile_context>
chip_gen: v7x
topology: tpu7x:2x2x1
jax: 0.10.0
libtpu: 0.0.40
codegen_flags: <defaults>
</compile_context>

<pallas_src>
import functools

import jax
import jax.numpy as jnp
from jax import lax
from jax.experimental import pallas as pl
from jax.experimental.pallas import tpu as pltpu

DEGREE = 3
# Deterministic degree-3 (cubic) spline / spline-wavelet polynomial coefficients.
# The wavelet kernel uses the same even terms and sign-flipped odd terms.
B_SPLINE_COEF = (1.0 / 24.0, 11.0 / 24.0, 11.0 / 24.0, 1.0 / 24.0)
WAVELET_COEF = (1.0 / 24.0, 11.0 / 24.0, -11.0 / 24.0, -1.0 / 24.0)
# TODO(synk): graph_construction / cal_b_spline / cal_spline_wavelet / GCN source
# code was not provided with the module; Gaussian-kernel adjacency + matrix-
# polynomial spline kernels + K-hop polynomial GCN are used as deterministic
# equivalents with the shapes the forward pass implies.


def _mgnn_kernel(x_ref, w_ref, b_ref, blk_ref, out_ref, *, neg_inv_bw, K, N, D):
    M = x_ref.shape[0]                # bblk * N rows (all graphs of this block)
    D2 = 2 * D
    x = x_ref[...]                    # (M, F) f32

    # ---- one wide bf16 weight matmul: [linear + k=0 GCN | b-spline hops | wavelet hops]
    yw = jnp.dot(x.astype(jnp.bfloat16), w_ref[...],
                 preferred_element_type=jnp.float32)          # (M, 2D + 2(K-1)D)
    base = yw[:, :D2] + b_ref[...]                            # linear + k=0 terms + bias

    if K > 1:
        # ---- block-diagonal Gaussian adjacency over all bblk graphs at once ----
        blk = blk_ref[...]                                    # (M, M) same-graph mask
        r = lax.broadcasted_iota(jnp.int32, (M, M), 0)
        c = lax.broadcasted_iota(jnp.int32, (M, M), 1)
        eye = (r == c).astype(jnp.float32)
        gram = lax.dot_general(x, x, (((1,), (1,)), ((), ())),
                               preferred_element_type=jnp.float32)     # x @ x.T
        sq_col = jnp.sum(x * x, axis=-1, keepdims=True)                # (M, 1) ||x_i||^2
        sq_row = jnp.sum(gram * eye, axis=-2, keepdims=True)           # (1, M) ||x_j||^2
        d2 = jnp.maximum(sq_col + sq_row - 2.0 * gram, 0.0)            # pairwise sq dists
        adj = jnp.exp(d2 * neg_inv_bw) * blk                           # zero off-graph
        adj = adj * pl.reciprocal(jnp.sum(adj, axis=-1, keepdims=True),
                                  approx=False)                        # row-normalize

        # ---- degree-3 spline / wavelet kernels (block-diag products stay block-diag)
        adj_bf = adj.astype(jnp.bfloat16)
        a2 = jnp.dot(adj_bf, adj_bf, preferred_element_type=jnp.float32)
        a3 = jnp.dot(a2.astype(jnp.bfloat16), adj_bf,
                     preferred_element_type=jnp.float32)
        even = B_SPLINE_COEF[0] * eye + B_SPLINE_COEF[1] * adj
        odd = B_SPLINE_COEF[2] * a2 + B_SPLINE_COEF[3] * a3
        b_kernel = (even + odd).astype(jnp.bfloat16)          # spline kernel
        w_kernel = (even - odd).astype(jnp.bfloat16)          # wavelet kernel

        # ---- K-hop GCN: sum_{k>=1} T^k (x @ W_k), Horner over the D=64 hop slices ----
        def hop_mix(ker_bf, col0):
            acc = yw[:, col0 + (K - 2) * D: col0 + (K - 1) * D]
            for k in range(K - 2, 0, -1):
                acc = yw[:, col0 + (k - 1) * D: col0 + k * D] + jnp.dot(
                    ker_bf, acc.astype(jnp.bfloat16),
                    preferred_element_type=jnp.float32)
            return jnp.dot(ker_bf, acc.astype(jnp.bfloat16),
                           preferred_element_type=jnp.float32)

        gcn1 = hop_mix(b_kernel, D2)                          # (M, D)
        gcn2 = hop_mix(w_kernel, D2 + (K - 1) * D)            # (M, D)

        out_ref[:, :D] = jnp.maximum(base[:, :D] + gcn1, 0.0).astype(out_ref.dtype)
        out_ref[:, D:] = jnp.maximum(base[:, D:] + gcn2, 0.0).astype(out_ref.dtype)
    else:
        # k=0 terms already folded into the fused weight.
        out_ref[...] = jnp.maximum(base, 0.0).astype(out_ref.dtype)


def _pick_block_b(B, N, target_rows=128):
    # Aim for bblk*N ~ 128 rows per step (full MXU tile on v5e, >=2 parallel
    # grid steps for v7x megacore at B=32).  On v6e, block_b can be overridden
    # to target 256 rows.
    want = max(1, target_rows // max(N, 1))
    bb = min(B, want)
    while bb > 1 and B % bb:
        bb -= 1
    return max(bb, 1)


def mgnn_forward(x, wb, ww, wl, bl, *, bandwidth, K, block_b=None):
    B, N, F = x.shape
    Kw, Fw, D = wb.shape
    assert Kw == K and Fw == F
    D2 = wl.shape[1]
    assert D2 == 2 * D

    # Host-side weight prep (free): fold linear + k=0 GCN terms, then concat all
    # hop weights into ONE lane-dense bf16 matrix (F, 2D + 2(K-1)D).
    w0_fused = wl + jnp.concatenate([wb[0], ww[0]], axis=-1)           # (F, 2D)
    parts = [w0_fused]
    if K > 1:
        parts.append(jnp.concatenate([wb[k] for k in range(1, K)], axis=-1))
        parts.append(jnp.concatenate([ww[k] for k in range(1, K)], axis=-1))
    w_all = jnp.concatenate(parts, axis=-1).astype(jnp.bfloat16)
    bl2 = bl.reshape(1, D2).astype(jnp.float32)

    bblk = block_b if block_b is not None else _pick_block_b(B, N)
    assert B % bblk == 0
    M = bblk * N
    x2d = x.reshape(B * N, F).astype(jnp.float32)

    # Block-diagonal "same graph" mask for one batch block (built once on host).
    bi = jnp.arange(M, dtype=jnp.int32) // N
    blk_mask = (bi[:, None] == bi[None, :]).astype(jnp.float32)        # (M, M)

    grid = (B // bblk,)
    out = pl.pallas_call(
        functools.partial(_mgnn_kernel, neg_inv_bw=-1.0 / float(bandwidth),
                          K=K, N=N, D=D),
        out_shape=jax.ShapeDtypeStruct((B * N, D2), jnp.float32),
        grid_spec=pltpu.PrefetchScalarGridSpec(
            num_scalar_prefetch=0,
            grid=grid,
            in_specs=[
                pl.BlockSpec((M, F), lambda b: (b, 0)),        # node features (batch block)
                pl.BlockSpec(w_all.shape, lambda b: (0, 0)),   # fused weights (broadcast)
                pl.BlockSpec(bl2.shape, lambda b: (0, 0)),     # linear bias
                pl.BlockSpec(blk_mask.shape, lambda b: (0, 0)),# block-diag mask
            ],
            out_specs=pl.BlockSpec((M, D2), lambda b: (b, 0)),
        ),
        compiler_params=pltpu.CompilerParams(
            dimension_semantics=("parallel",)),
    )(x2d, w_all, bl2, blk_mask)
    return out.reshape(B, N * D2)   # == akgcn.flatten(start_dim=-2, end_dim=-1)


if __name__ == "__main__":
    B, N = 32, 8                       # 32 graphs of 8 nodes (blocked 16/step -> 2 steps)
    IN_DIM, OUT_DIM, K = 256, 64, 3    # Linear(256, 128) in __init__ forces 256 -> 2*64
    BANDWIDTH = 2.0 * IN_DIM

    key = jax.random.PRNGKey(0)
    k1, k2, k3, k4, k5 = jax.random.split(key, 5)
    scale = 1.0 / (IN_DIM ** 0.5)
    x = jax.random.normal(k1, (B, N, IN_DIM), jnp.float32)
    wb = jax.random.normal(k2, (K, IN_DIM, OUT_DIM), jnp.float32) * scale
    ww = jax.random.normal(k3, (K, IN_DIM, OUT_DIM), jnp.float32) * scale
    wl = jax.random.normal(k4, (IN_DIM, 2 * OUT_DIM), jnp.float32) * scale
    bl = jax.random.normal(k5, (1, 2 * OUT_DIM), jnp.float32) * 0.01

    y = mgnn_forward(x, wb, ww, wl, bl, bandwidth=BANDWIDTH, K=K)
    jax.block_until_ready(y)
    assert y.shape == (B, N * 2 * OUT_DIM), y.shape
    assert bool(jnp.all(jnp.isfinite(y)))
    print("KERNEL_OK")
</pallas_src>

<mosaic_0001>
module attributes {stable_mosaic.version = 11 : i64} {
  func.func @_mgnn_kernel(%arg0: i32, %arg1: memref<128x256xf32, #tpu.memory_space<vmem>>, %arg2: memref<256x384xbf16, #tpu.memory_space<vmem>>, %arg3: memref<1x128xf32, #tpu.memory_space<vmem>>, %arg4: memref<128x128xf32, #tpu.memory_space<vmem>>, %arg5: memref<128x128xf32, #tpu.memory_space<vmem>>) attributes {dimension_semantics = [#tpu.dimension_semantics<parallel>], iteration_bounds = array<i64: 2>, scalar_prefetch = 0 : i64, scratch_operands = 0 : i64, tpu.core_type = #tpu.core_type<tc>, window_params = [{transform_indices = @transform_0, window_bounds = array<i64: 128, 256>}, {pipeline_mode = #tpu.pipeline_mode<synchronous>, transform_indices = @transform_1, window_bounds = array<i64: 256, 384>}, {pipeline_mode = #tpu.pipeline_mode<synchronous>, transform_indices = @transform_2, window_bounds = array<i64: 1, 128>}, {pipeline_mode = #tpu.pipeline_mode<synchronous>, transform_indices = @transform_3, window_bounds = array<i64: 128, 128>}, {transform_indices = @transform_4, window_bounds = array<i64: 128, 128>}]} {
    %c0 = arith.constant 0 : index
    %c0_0 = arith.constant 0 : index
    %0 = vector.load %arg1[%c0, %c0_0] : memref<128x256xf32, #tpu.memory_space<vmem>>, vector<128x256xf32>
    %1 = arith.truncf %0 : vector<128x256xf32> to vector<128x256xbf16>
    %c0_1 = arith.constant 0 : index
    %c0_2 = arith.constant 0 : index
    %2 = vector.load %arg2[%c0_1, %c0_2] : memref<256x384xbf16, #tpu.memory_space<vmem>>, vector<256x384xbf16>
    %cst = arith.constant dense<0.000000e+00> : vector<128x384xf32>
    %3 = tpu.matmul %1, %2, %cst {dimension_numbers = #tpu.dot_dimension_numbers<[1], [0], [0], [1], [0, 0, 1, 1], [], []>} : vector<128x256xbf16>, vector<256x384xbf16>, vector<128x384xf32> -> vector<128x384xf32>
    %4 = vector.extract_strided_slice %3 {offsets = [0, 0], sizes = [128, 128], strides = [1, 1]} : vector<128x384xf32> to vector<128x128xf32>
    %c0_3 = arith.constant 0 : index
    %c0_4 = arith.constant 0 : index
    %5 = vector.load %arg3[%c0_3, %c0_4] : memref<1x128xf32, #tpu.memory_space<vmem>>, vector<1x128xf32>
    %6 = vector.broadcast %5 : vector<1x128xf32> to vector<128x128xf32>
    %7 = arith.addf %4, %6 : vector<128x128xf32>
    %c0_5 = arith.constant 0 : index
    %c0_6 = arith.constant 0 : index
    %8 = vector.load %arg4[%c0_5, %c0_6] : memref<128x128xf32, #tpu.memory_space<vmem>>, vector<128x128xf32>
    %9 = tpu.iota {dimensions = array<i32: 0>} : vector<128x128xi32>
    %10 = tpu.iota {dimensions = array<i32: 1>} : vector<128x128xi32>
    %11 = arith.cmpi eq, %9, %10 : vector<128x128xi32>
    %12 = arith.extui %11 : vector<128x128xi1> to vector<128x128xi32>
    %13 = arith.sitofp %12 : vector<128x128xi32> to vector<128x128xf32>
    %cst_7 = arith.constant dense<0.000000e+00> : vector<128x128xf32>
    %14 = tpu.matmul %0, %0, %cst_7 {dimension_numbers = #tpu.dot_dimension_numbers<[1], [1], [0], [0], [0, 0, 1, 0], [], []>} : vector<128x256xf32>, vector<128x256xf32>, vector<128x128xf32> -> vector<128x128xf32>
    %15 = arith.mulf %0, %0 : vector<128x256xf32>
    %cst_8 = arith.constant dense<0.000000e+00> : vector<128xf32>
    %16 = vector.multi_reduction <add>, %15, %cst_8 [1] : vector<128x256xf32> to vector<128xf32>
    %17 = vector.shape_cast %16 : vector<128xf32> to vector<128x1xf32>
    %18 = arith.mulf %14, %13 : vector<128x128xf32>
    %cst_9 = arith.constant dense<0.000000e+00> : vector<128xf32>
    %19 = vector.multi_reduction <add>, %18, %cst_9 [0] : vector<128x128xf32> to vector<128xf32>
    %20 = vector.shape_cast %19 : vector<128xf32> to vector<1x128xf32>
    %21 = vector.broadcast %17 : vector<128x1xf32> to vector<128x128xf32>
    %22 = vector.broadcast %20 : vector<1x128xf32> to vector<128x128xf32>
    %23 = arith.addf %21, %22 : vector<128x128xf32>
    %cst_10 = arith.constant 2.000000e+00 : f32
    %24 = vector.broadcast %cst_10 : f32 to vector<128x128xf32>
    %25 = arith.mulf %24, %14 : vector<128x128xf32>
    %26 = arith.subf %23, %25 : vector<128x128xf32>
    %cst_11 = arith.constant 0.000000e+00 : f32
    %27 = vector.broadcast %cst_11 : f32 to vector<128x128xf32>
    %28 = arith.maximumf %26, %27 : vector<128x128xf32>
    %cst_12 = arith.constant -0.001953125 : f32
    %29 = vector.broadcast %cst_12 : f32 to vector<128x128xf32>
    %30 = arith.mulf %28, %29 : vector<128x128xf32>
    %31 = math.exp %30 : vector<128x128xf32>
    %32 = arith.mulf %31, %8 : vector<128x128xf32>
    %cst_13 = arith.constant dense<0.000000e+00> : vector<128xf32>
    %33 = vector.multi_reduction <add>, %32, %cst_13 [1] : vector<128x128xf32> to vector<128xf32>
    %34 = vector.shape_cast %33 : vector<128xf32> to vector<128x1xf32>
    %35 = tpu.reciprocal %34 : vector<128x1xf32> -> vector<128x1xf32>
    %36 = vector.broadcast %35 : vector<128x1xf32> to vector<128x128xf32>
    %37 = arith.mulf %32, %36 : vector<128x128xf32>
    %38 = arith.truncf %37 : vector<128x128xf32> to vector<128x128xbf16>
    %cst_14 = arith.constant dense<0.000000e+00> : vector<128x128xf32>
    %39 = tpu.matmul %38, %38, %cst_14 {dimension_numbers = #tpu.dot_dimension_numbers<[1], [0], [0], [1], [0, 0, 1, 1], [], []>} : vector<128x128xbf16>, vector<128x128xbf16>, vector<128x128xf32> -> vector<128x128xf32>
    %40 = arith.truncf %39 : vector<128x128xf32> to vector<128x128xbf16>
    %cst_15 = arith.constant dense<0.000000e+00> : vector<128x128xf32>
    %41 = tpu.matmul %40, %38, %cst_15 {dimension_numbers = #tpu.dot_dimension_numbers<[1], [0], [0], [1], [0, 0, 1, 1], [], []>} : vector<128x128xbf16>, vector<128x128xbf16>, vector<128x128xf32> -> vector<128x128xf32>
    %cst_16 = arith.constant 0.0416666679 : f32
    %42 = vector.broadcast %cst_16 : f32 to vector<128x128xf32>
    %43 = arith.mulf %42, %13 : vector<128x128xf32>
    %cst_17 = arith.constant 0.458333343 : f32
    %44 = vector.broadcast %cst_17 : f32 to vector<128x128xf32>
    %45 = arith.mulf %44, %37 : vector<128x128xf32>
    %46 = arith.addf %43, %45 : vector<128x128xf32>
    %cst_18 = arith.constant 0.458333343 : f32
    %47 = vector.broadcast %cst_18 : f32 to vector<128x128xf32>
    %48 = arith.mulf %47, %39 : vector<128x128xf32>
    %cst_19 = arith.constant 0.0416666679 : f32
    %49 = vector.broadcast %cst_19 : f32 to vector<128x128xf32>
    %50 = arith.mulf %49, %41 : vector<128x128xf32>
    %51 = arith.addf %48, %50 : vector<128x128xf32>
    %52 = arith.addf %46, %51 : vector<128x128xf32>
    %53 = arith.truncf %52 : vector<128x128xf32> to vector<128x128xbf16>
    %54 = arith.subf %46, %51 : vector<128x128xf32>
    %55 = arith.truncf %54 : vector<128x128xf32> to vector<128x128xbf16>
    %56 = vector.extract_strided_slice %3 {offsets = [0, 192], sizes = [128, 64], strides = [1, 1]} : vector<128x384xf32> to vector<128x64xf32>
    %57 = vector.extract_strided_slice %3 {offsets = [0, 128], sizes = [128, 64], strides = [1, 1]} : vector<128x384xf32> to vector<128x64xf32>
    %58 = arith.truncf %56 : vector<128x64xf32> to vector<128x64xbf16>
    %cst_20 = arith.constant dense<0.000000e+00> : vector<128x64xf32>
    %59 = tpu.matmul %53, %58, %cst_20 {dimension_numbers = #tpu.dot_dimension_numbers<[1], [0], [0], [1], [0, 0, 1, 1], [], []>} : vector<128x128xbf16>, vector<128x64xbf16>, vector<128x64xf32> -> vector<128x64xf32>
    %60 = arith.addf %57, %59 : vector<128x64xf32>
    %61 = arith.truncf %60 : vector<128x64xf32> to vector<128x64xbf16>
    %cst_21 = arith.constant dense<0.000000e+00> : vector<128x64xf32>
    %62 = tpu.matmul %53, %61, %cst_21 {dimension_numbers = #tpu.dot_dimension_numbers<[1], [0], [0], [1], [0, 0, 1, 1], [], []>} : vector<128x128xbf16>, vector<128x64xbf16>, vector<128x64xf32> -> vector<128x64xf32>
    %63 = vector.extract_strided_slice %3 {offsets = [0, 320], sizes = [128, 64], strides = [1, 1]} : vector<128x384xf32> to vector<128x64xf32>
    %64 = vector.extract_strided_slice %3 {offsets = [0, 256], sizes = [128, 64], strides = [1, 1]} : vector<128x384xf32> to vector<128x64xf32>
    %65 = arith.truncf %63 : vector<128x64xf32> to vector<128x64xbf16>
    %cst_22 = arith.constant dense<0.000000e+00> : vector<128x64xf32>
    %66 = tpu.matmul %55, %65, %cst_22 {dimension_numbers = #tpu.dot_dimension_numbers<[1], [0], [0], [1], [0, 0, 1, 1], [], []>} : vector<128x128xbf16>, vector<128x64xbf16>, vector<128x64xf32> -> vector<128x64xf32>
    %67 = arith.addf %64, %66 : vector<128x64xf32>
    %68 = arith.truncf %67 : vector<128x64xf32> to vector<128x64xbf16>
    %cst_23 = arith.constant dense<0.000000e+00> : vector<128x64xf32>
    %69 = tpu.matmul %55, %68, %cst_23 {dimension_numbers = #tpu.dot_dimension_numbers<[1], [0], [0], [1], [0, 0, 1, 1], [], []>} : vector<128x128xbf16>, vector<128x64xbf16>, vector<128x64xf32> -> vector<128x64xf32>
    %70 = vector.extract_strided_slice %7 {offsets = [0, 0], sizes = [128, 64], strides = [1, 1]} : vector<128x128xf32> to vector<128x64xf32>
    %71 = arith.addf %70, %62 : vector<128x64xf32>
    %cst_24 = arith.constant 0.000000e+00 : f32
    %72 = vector.broadcast %cst_24 : f32 to vector<128x64xf32>
    %73 = arith.maximumf %71, %72 : vector<128x64xf32>
    %c0_25 = arith.constant 0 : index
    %c0_26 = arith.constant 0 : index
    %74 = vector.load %arg5[%c0_25, %c0_26] : memref<128x128xf32, #tpu.memory_space<vmem>>, vector<128x64xf32>
    tpu.vector_store %arg5[%c0_25, %c0_26], %73 {strides = array<i32>} : memref<128x128xf32, #tpu.memory_space<vmem>>, vector<128x64xf32>,
    %75 = vector.extract_strided_slice %7 {offsets = [0, 64], sizes = [128, 64], strides = [1, 1]} : vector<128x128xf32> to vector<128x64xf32>
    %76 = arith.addf %75, %69 : vector<128x64xf32>
    %cst_27 = arith.constant 0.000000e+00 : f32
    %77 = vector.broadcast %cst_27 : f32 to vector<128x64xf32>
    %78 = arith.maximumf %76, %77 : vector<128x64xf32>
    %c0_28 = arith.constant 0 : index
    %c64 = arith.constant 64 : index
    %79 = vector.load %arg5[%c0_28, %c64] : memref<128x128xf32, #tpu.memory_space<vmem>>, vector<128x64xf32>
    tpu.vector_store %arg5[%c0_28, %c64], %78 {strides = array<i32>} : memref<128x128xf32, #tpu.memory_space<vmem>>, vector<128x64xf32>,
    return
  }
  func.func @transform_0(%arg0: i32) -> (i32, i32) {
    %c0_i32 = arith.constant 0 : i32
    %c0_i32_0 = arith.constant 0 : i32
    return %arg0, %c0_i32 : i32, i32
  }
  func.func @transform_1(%arg0: i32) -> (i32, i32) {
    %c0_i32 = arith.constant 0 : i32
    %c0_i32_0 = arith.constant 0 : i32
    %c0_i32_1 = arith.constant 0 : i32
    return %c0_i32, %c0_i32_0 : i32, i32
  }
  func.func @transform_2(%arg0: i32) -> (i32, i32) {
    %c0_i32 = arith.constant 0 : i32
    %c0_i32_0 = arith.constant 0 : i32
    %c0_i32_1 = arith.constant 0 : i32
    return %c0_i32, %c0_i32_0 : i32, i32
  }
  func.func @transform_3(%arg0: i32) -> (i32, i32) {
    %c0_i32 = arith.constant 0 : i32
    %c0_i32_0 = arith.constant 0 : i32
    %c0_i32_1 = arith.constant 0 : i32
    return %c0_i32, %c0_i32_0 : i32, i32
  }
  func.func @transform_4(%arg0: i32) -> (i32, i32) {
    %c0_i32 = arith.constant 0 : i32
    %c0_i32_0 = arith.constant 0 : i32
    return %arg0, %c0_i32 : i32, i32
  }
}

</mosaic_0001>

<bundles_post_ra>
// kernel: tpu_custom_call.1
= control target key start
LH: loop header
LB: loop body
LE: loop exit
PB: predicated region body
PF: predicated region fallthrough
CT: control target
= control target key end

     0   :  { %9 = vsyncpa [#allocation3], 0  ;;  %s4867_s0 = inlined_call_operand.hbm [shape: f32[256,256], index: 0, kind: input, shape index: {}]   ;;  %s4868_s1 = inlined_call_operand.hbm [shape: bf16[256,384], index: 1, kind: input, shape index: {}]   ;;  %s4869_s2 = inlined_call_operand.vmem [shape: f32[1,128], index: 2, kind: input, shape index: {}]   ;;  %s4870_s3 = inlined_call_operand.hbm [shape: f32[128,128], index: 3, kind: input, shape index: {}]   ;;  %s4871_s4 = inlined_call_operand.hbm [shape: f32[256,128], index: 4, kind: output, shape index: {}]  }
   0x1   :  { %11 = vsyncpa [#allocation3 + $0x1], 0 }
   0x2   :  { %12 = vsyncpa [#allocation6], 0 }
   0x3   :  { %13 = vsyncpa [#allocation4], 0 }
   0x4   :  { %15 = vsyncpa [#allocation4 + $0x1], 0  ;;  %s3414_s15 = smov 0   ;;  %s3416_s16 = smov 0  }
   0x5   :  { %s3418_s17 = smov 0   ;;  %s3420_s18 = smov 0  }
   0x6 LB: > { %s3435_s19 = sadd.s32 4294967295, %s3373_s18   ;;  %s2525_s20 = sadd.s32 4294967294, %s3373_s18   ;;  %s3373_s18 = sphi %s3420_s18, %s5112_s18   ;;  %s3369_s17 = sphi %s3418_s17, %s5111_s17   ;;  %s3365_s16 = sphi %s3416_s16, %s5110_s16   ;;  %s3361_s15 = sphi %s3414_s15, %s5109_s15  }
   0x7   : > { %p41_p0 = scmp.ne.s32.totalorder %s3365_s16, %s3361_s15  ;;  %p4872_p1 = scmp.eq.s32.totalorder %s3435_s19, 0 }
   0x8   : > { %p134_p3 = scmp.eq.s32.totalorder %s2525_s20, 1  ;;  %p2526_p5 = scmp.ge.s32.totalorder %s3373_s18, 1 }
   0x9   : > { %p3444_p4 = por %p4872_p1, %p41_p0  ;;  %p141_p7 = scmp.lt.s32.totalorder %s3373_s18, 3 }
   0xa   : > { %p3449_p6 = por %p134_p3, %p41_p0  ;;  %s3375_s24 = smov [#allocation5]  }
   0xb   : > { %s4928_s21 = scalar_select %p3444_p4, 1, 0 }
   0xc   : > { %s4929_s22 = scalar_select %p3449_p6, 1, 0 }
   0xd   : > { %p3454_p8 = pnand %p2526_p5, %p141_p7  ;;  %s153_s25 = sshll.u32 %s3375_s24, 4  ;;  %s3458_s25 = int_to_ptr.vmem [resolvable:$true] %s153_s25 }
   0xe   : > { %s3376_s27 = smov [#allocation7]   ;;  %s3217_s5 = scalar_lea.hbm %s4868_s1, 6144 }
   0xf   : > { %p3024_p9 = pneg %p3454_p8  ;;  %s169_s28 = sshll.u32 %s3376_s27, 4  ;;  %s3469_s28 = int_to_ptr.vmem [resolvable:$true] %s169_s28 }
  0x10   : > { %p3218_p12 = scmp.ne.s32.totalorder %s4868_s1, %s3217_s5  ;;  %p3224_p5 = scmp.lt.u32.totalorder %s3217_s5, %s4868_s1 }
  0x11   : > { %p3465_p11 = pnand %p3024_p9, %p4872_p1 }
  0x13   : > { %p3219_p13 = pneg %p3465_p11 }
  0x15   : > { %p3220_p0 = pnand %p3219_p13, %p3218_p12 }
  0x17   : > { %p3221_p3 = pneg %p3220_p0 }
  0x19   : > { %p3226_p7 = pnand %p3224_p5, %p3221_p3 }
  0x1b   : > { %3229 = shalt.err (!%p3226_p7)
}
  0x1c   : > { %s3230_s10 = scalar_lea.vmem %s3458_s25, 6144  ;;  %p3238_p2 = scmp.lt.s32.totalorder %s3458_s25, %s3458_s25 }
  0x1d   : > { %p3231_p9 = scmp.ne.s32.totalorder %s3458_s25, %s3230_s10  ;;  %p3239_p12 = scmp.lt.s32.totalorder %s3230_s10, %s3230_s10 }
  0x1f   : > { %p3233_p10 = pnand %p3231_p9, %p3219_p13  ;;  %p3240_p0 = por %p3239_p12, %p3238_p2 }
  0x21   : > { %p3234_p1 = pneg %p3233_p10 }
  0x23   : > { %p3241_p6 = pnand %p3240_p0, %p3234_p1 }
  0x25   : > { %3244 = shalt.err (!%p3241_p6)
}
  0x26   : > { %s3377_s11 = smov 192   ;;  %s3378_s12 = smov 12  }
  0x27   : > { %3027 = dma.hbm_to_vmem [thread:$0]  (!%p3465_p11), %s4868_s1, 6144, %s3458_s25, [#allocation6], %s3377_s11, %s3377_s11, %s3378_s12  }
  0x28   : > { %s3245_s27 = scalar_lea.hbm %s4870_s3, 2048 }
  0x29   : > { %p3246_p2 = scmp.ne.s32.totalorder %s4870_s3, %s3245_s27  ;;  %p3252_p10 = scmp.lt.u32.totalorder %s3245_s27, %s4870_s3 }
  0x2b   : > { %p3248_p1 = pnand %p3246_p2, %p3219_p13 }
  0x2d   : > { %p3249_p6 = pneg %p3248_p1 }
  0x2f   : > { %p3254_p3 = pnand %p3252_p10, %p3249_p6 }
  0x31   : > { %3257 = shalt.err (!%p3254_p3)
}
  0x32   : > { %s3258_s25 = scalar_lea.vmem %s3469_s28, 2048  ;;  %p3266_p12 = scmp.lt.s32.totalorder %s3469_s28, %s3469_s28 }
  0x33   : > { %p3259_p5 = scmp.ne.s32.totalorder %s3469_s28, %s3258_s25  ;;  %p3267_p0 = scmp.lt.s32.totalorder %s3258_s25, %s3258_s25 }
  0x35   : > { %p3261_p7 = pnand %p3259_p5, %p3219_p13  ;;  %p3268_p2 = por %p3267_p0, %p3266_p12 }
  0x37   : > { %p3262_p9 = pneg %p3261_p7 }
  0x39   : > { %p3269_p1 = pnand %p3268_p2, %p3262_p9 }
  0x3b   : > { %3272 = shalt.err (!%p3269_p1)
}
  0x3c   : > { %s3379_s7 = smov 128   ;;  %s3380_s8 = smov 8  }
  0x3d   : > { %3030 = dma.hbm_to_vmem [thread:$0]  (!%p3465_p11), %s4870_s3, 2048, %s3469_s28, [#allocation6], %s3379_s7, %s3379_s7, %s3380_s8  }
  0x3e   : > { %s3524_s11 = sadd.s32 1, %s3373_s18   ;;  %s28_s13 = sadd.s32 1, %s3369_s17 }
  0x3f   : > { %s25_s12 = ssub.s32 %s3373_s18, %s3524_s11  ;;  %p35_p6 = scmp.ne.s32.totalorder %s3369_s17, %s3365_s16 }
  0x40   : > { %p26_p13 = scmp.eq.s32.totalorder %s25_s12, 0  ;;  %p36_p10 = scmp.eq.s32.totalorder %s3373_s18, 0 }
  0x41   : > { %p4932_p5 = scmp.eq.s32.totalorder %s3435_s19, 1  ;;  %p3041_p9 = scmp.lt.s32.totalorder %s3373_s18, 2 }
  0x42   : > { %s3533_s14 = scalar_select %p26_p13, %s3369_s17, %s28_s13  }
  0x43   : > { %p37_p3 = por %p36_p10, %p35_p6  ;;  %p3537_p7 = por %p4932_p5, %p35_p6 }
  0x44   : > { %s183_s26 = sand.u32 1, %s3369_s17   ;;  %s2610_s28 = sshll.u32 %s3373_s18, 12 }
  0x45   : > { %s4933_s20 = scalar_select %p3537_p7, 1, 0 }
  0x46   : > { %s2530_s24 = sshll.u32 %s183_s26, 8  ;;  %s3547_s30 = scalar_lea.hbm %s4867_s0, %s2610_s28 }
  0x47   : > { %s187_s5 = scalar_lea.vmem [#allocation2], %s2530_s24  ;;  %p3551_p11 = pnand %p3041_p9, %p37_p3 }
  0x48   : > { %s195_s6 = sshll.u32 %s187_s5, 4  ;;  %s3555_s7 = scalar_lea.sflag [#allocation3], %s183_s26  ;;  %s3549_s6 = int_to_ptr.vmem [resolvable:$true] %s195_s6 }
  0x49   : > { %s3273_s8 = scalar_lea.hbm %s3547_s30, 4096  ;;  %p3275_p0 = pneg %p3551_p11 }
  0x4a   : > { %p3274_p12 = scmp.ne.s32.totalorder %s3547_s30, %s3273_s8  ;;  %s3278_s12 = scalar_lea.hbm %s4867_s0, 8192 }
  0x4b   : > { %p3279_p13 = scmp.lt.u32.totalorder %s3547_s30, %s4867_s0  ;;  %p3280_p6 = scmp.lt.u32.totalorder %s3278_s12, %s3273_s8 }
  0x4c   : > { %p3276_p2 = pnand %p3275_p0, %p3274_p12  ;;  %p3282_p3 = scmp.lt.u32.totalorder %s3273_s8, %s3547_s30 }
  0x4d   : > { %p3281_p10 = por %p3280_p6, %p3279_p13 }
  0x4e   : > { %p3277_p1 = pneg %p3276_p2 }
  0x4f   : > { %p3283_p5 = por %p3282_p3, %p3281_p10 }
  0x51   : > { %p3284_p9 = pnand %p3283_p5, %p3277_p1 }
  0x53   : > { %3287 = shalt.err (!%p3284_p9)
}
  0x54   : > { %s3288_s26 = scalar_lea.vmem %s3549_s6, 4096  ;;  %s3381_s28 = smov [#allocation2]  }
  0x55   : > { %p3289_p12 = scmp.ne.s32.totalorder %s3549_s6, %s3288_s26  ;;  %s3293_s27 = sshll.u32 %s3381_s28, 4  ;;  %s3294_s27 = int_to_ptr.vmem [resolvable:$false] %s3293_s27 }
  0x56   : > { %s3295_s29 = scalar_lea.vmem %s3294_s27, 8192  ;;  %p3296_p4 = scmp.lt.s32.totalorder %s3549_s6, %s3294_s27 }
  0x57   : > { %p3291_p2 = pnand %p3289_p12, %p3275_p0  ;;  %p3297_p13 = scmp.lt.s32.totalorder %s3295_s29, %s3288_s26 }
  0x59   : > { %p3292_p7 = pneg %p3291_p2  ;;  %p3298_p6 = por %p3297_p13, %p3296_p4 }
  0x5b   : > { %p3299_p10 = pnand %p3298_p6, %p3292_p7 }
  0x5d   : > { %3302 = shalt.err (!%p3299_p10)
}
  0x5e   : > { %s3382_s5 = smov 256   ;;  %s3383_s8 = smov 16  }
  0x5f   : > { %3034 = dma.hbm_to_vmem [thread:$0]  (!%p3551_p11), %s3547_s30, 4096, %s3549_s6, %s3555_s7, %s3382_s5, %s3382_s5, %s3383_s8  }
  0x60   : > { %207 = sbr.rel (%p3454_p8) target bundleno = 1818 (0x71a), region = 36 }
  0x67   : > { %s3586_s9 = sand.u32 1, %s3365_s16   ;;  %p4935_p4 = scmp.ne.s32.totalorder %s4928_s21, 0 }
  0x68   : > { %s2535_s10 = sshll.u32 %s3586_s9, 8  ;;  %s210_s12 = scalar_lea.sflag [#allocation3], %s3586_s9 }
  0x69   : > { %s3590_s13 = scalar_lea.vmem [#allocation2], %s2535_s10 }
  0x6a   : > { %3348 = dma.done.wait (%p4935_p4), %s210_s12, 4096  }
  0x6b   : > { %3350 = vsyncadd (%p4935_p4), %s210_s12, 4294963200  ;;  %p4936_p7 = scmp.eq.s32.totalorder %s3435_s19, 0 }
  0x6d   : > { %3352 = dma.done.wait (%p4936_p7), [#allocation6], 8192   ;;  %p4937_p8 = pmov %p4936_p7 }
  0x6e   : > { %v3089_v0 = vld [vmem:[#allocation5 + $0xc8] ss:$12 sps:$4 sm:$0xff]   ;;  %v3091_v2 = vld [vmem:[#allocation5 + $0xe0] ss:$12 sps:$4 sm:$0xff]   ;;  %v3093_v4 = vld [vmem:[#allocation5 + $0xf8] ss:$12 sps:$4 sm:$0xff]  }
  0x6f   : > { %3354 = vsyncadd (%p4937_p8), [#allocation6], 4294959104  ;;  %v3090_v1 = vld [vmem:[#allocation5 + $0x8] ss:$12 sps:$4 sm:$0xff]   ;;  %2612 = vmatprep.subr.bf16.mxu1 %v3089_v0  ;;  %v3092_v3 = vld [vmem:[#allocation5 + $0x20] ss:$12 sps:$4 sm:$0xff]  }
  0x70   : > { %2613 = vmatpush3.bf16.msra.mxu1 %v3090_v1  ;;  %v3094_v5 = vld [vmem:[#allocation5 + $0x38] ss:$12 sps:$4 sm:$0xff]   ;;  %v3095_v6 = vld [vmem:[#allocation5 + $0x110] ss:$12 sps:$4 sm:$0xff]   ;;  %v3097_v8 = vld [vmem:[#allocation5 + $0x128] ss:$12 sps:$4 sm:$0xff]  }
  0x71   : > { %2614 = vmatprep.subr.bf16.mxu1 %v3091_v2  ;;  %v3096_v7 = vld [vmem:[#allocation5 + $0x50] ss:$12 sps:$4 sm:$0xff]   ;;  %v3098_v9 = vld [vmem:[#allocation5 + $0x68] ss:$12 sps:$4 sm:$0xff]   ;;  %v3099_v10 = vld [vmem:[#allocation5 + $0x140] ss:$12 sps:$4 sm:$0xff]  }
  0x72   : > { %v3601_v11 = vld [vmem:[%s3590_s13 + $0x8] sm:$0xff]  ;;  %v3604_v12 = vld [vmem:[%s3590_s13 + $0x18] sm:$0xff]  ;;  %v3609_v19 = vld [vmem:[%s3590_s13] sm:$0xff]  ;;  %s3385_s21 = smov 64   ;;  %s2538_s6 = sshll.u32 %s3586_s9, 7 }
  0x73   : > { %v282_v13 = vpack.c.bf16 %v3604_v12, %v3601_v11  ;;  %v3100_v14 = vld [vmem:[#allocation5 + $0x80] ss:$12 sps:$4 sm:$0xff]   ;;  %v3101_v15 = vld [vmem:[#allocation5 + $0x158] ss:$12 sps:$4 sm:$0xff]   ;;  %v3103_v17 = vld [vmem:[#allocation5 + $0x170] ss:$12 sps:$4 sm:$0xff]   ;;  %v1078_v37 = vmul.f32 %v3609_v19, %v3609_v19  ;;  %v1079_v39 = vmul.f32 %v3601_v11, %v3601_v11  ;;  %v1081_v44 = vmul.f32 %v3604_v12, %v3604_v12 }
  0x74   : > { %2615 = vmatpush3.bf16.msra.mxu1 %v3092_v3  ;;  %v3102_v16 = vld [vmem:[#allocation5 + $0x98] ss:$12 sps:$4 sm:$0xff]   ;;  %v3104_v18 = vld [vmem:[#allocation5 + $0xb0] ss:$12 sps:$4 sm:$0xff]   ;;  %v3615_v21 = vld [vmem:[%s3590_s13 + $0x28] sm:$0xff]  ;;  %s4658_s25 = scalar_lea.vmem [#allocation8], %s2538_s6 }
  0x75   : > { %2616 = vmatprep.subr.bf16.mxu1 %v3093_v4  ;;  %762 = vmatprep.mubr.bf16.mxu1 %v282_v13  ;;  %v3612_v20 = vld [vmem:[%s3590_s13 + $0x10] sm:$0xff]  ;;  %v3618_v22 = vld [vmem:[%s3590_s13 + $0x38] sm:$0xff]  ;;  %v3107_v24 = vld [vmem:[#allocation5] ss:$12 sps:$4 sm:$0xff]   ;;  %v1083_v36 = vmul.f32 %v3615_v21, %v3615_v21  ;;  %v1110_v48 = vadd.f32 %v1079_v39, %v1078_v37  ;;  %s2611_s7 = sshll.u32 %s3435_s19, 11  ;;  %s2433_s24 = sshll.u32 %s4658_s25, 4  ;;  %s4819_s24 = int_to_ptr.vmem [resolvable:$true] %s2433_s24 }
  0x76   : > { %649 = vmatprep.mubr.bf16.mxu0 %v282_v13  ;;  %v3105_v23 = vld [vmem:[#allocation5 + $0x4] ss:$12 sps:$4 sm:$0xff]   ;;  %v3108_v25 = vld [vmem:[#allocation5 + $0x1c] ss:$12 sps:$4 sm:$0xff]   ;;  %v3622_v26 = vpack.c.bf16 %v3612_v20, %v3609_v19  ;;  %v3626_v28 = vpack.c.bf16 %v3618_v22, %v3615_v21  ;;  %v3111_v29 = vld [vmem:[#allocation5 + $0x34] ss:$12 sps:$4 sm:$0xff]   ;;  %v1085_v41 = vmul.f32 %v3618_v22, %v3618_v22  ;;  %v1080_v42 = vmul.f32 %v3612_v20, %v3612_v20  ;;  %s4817_s27 = scalar_lea.hbm %s4871_s4, %s2611_s7 }
  0x77   : > { %617 = vmatprep.subr.bf16.mxu0 %v3105_v23  ;;  %v3110_v27 = vld [vmem:[#allocation5 + $0x18] ss:$12 sps:$4 sm:$0xff]   ;;  %v3633_v31 = vld [vmem:[%s3590_s13 + $0x30] sm:$0xff]  ;;  %v3637_v33 = vld [vmem:[%s3590_s13 + $0x48] sm:$0xff]  ;;  %1111 = vadd.xlane.f32.xlu0 %v1110_v48  ;;  %s2420_s19 = scalar_lea.sflag [#allocation4], %s3586_s9  ;;  %s3303_s29 = scalar_lea.vmem %s4819_s24, 2048 }
  0x78   : > { %2617 = vmatpush3.bf16.msra.mxu1 %v3094_v5  ;;  %618 = vmatpush1.bf16.msra.mxu0 %v3107_v24  ;;  %v3629_v30 = vld [vmem:[%s3590_s13 + $0x20] sm:$0xff]  ;;  %v3113_v32 = vld [vmem:[#allocation5 + $0x30] ss:$12 sps:$4 sm:$0xff]   ;;  %v3114_v34 = vld [vmem:[#allocation5 + $0x4c] ss:$12 sps:$4 sm:$0xff]   ;;  %v1084_v40 = vmul.f32 %v3633_v31, %v3633_v31  ;;  %v1113_v54 = vadd.f32 %v1081_v44, %v1080_v42  ;;  %v1087_v57 = vmul.f32 %v3637_v33, %v3637_v33  ;;  %p3304_p11 = scmp.ne.s32.totalorder %s4819_s24, %s3303_s29  ;;  %p5106_p0 = scmp.ne.s32.totalorder %s4933_s20, 0 }
  0x79   : > { %2618 = vmatprep.subr.bf16.mxu1 %v3095_v6  ;;  %619 = vmatprep.subr.bf16.mxu0 %v3108_v25  ;;  %v1082_v35 = vmul.f32 %v3629_v30, %v3629_v30  ;;  %v3646_v38 = vld [vmem:[%s3590_s13 + $0x58] sm:$0xff]  ;;  %v3660_v45 = vpack.c.bf16 %v3633_v31, %v3629_v30  ;;  %v3663_v46 = vld [vmem:[%s3590_s13 + $0x50] sm:$0xff]  ;;  %v3673_v52 = vld [vmem:[%s3590_s13 + $0x40] sm:$0xff]  ;;  %s3386_s5 = smov [#allocation8]  }
  0x7a   : > { %v3116_v47 = vld [vmem:[#allocation5 + $0x48] ss:$12 sps:$4 sm:$0xff]   ;;  %v3667_v49 = vpack.c.bf16 %v3646_v38, %v3637_v33  ;;  %v3117_v50 = vld [vmem:[#allocation5 + $0x64] ss:$12 sps:$4 sm:$0xff]   ;;  %v1088_v51 = vmul.f32 %v3663_v46, %v3663_v46  ;;  %v1119_v53 = vadd.f32 %v1085_v41, %v1084_v40  ;;  %v1089_v55 = vmul.f32 %v3646_v38, %v3646_v38  ;;  %v3687_v59 = vld [vmem:[%s3590_s13 + $0x78] sm:$0xff]  ;;  %p3305_p1 = pnand %p3304_p11, %p5106_p0  ;;  %s3307_s8 = sshll.u32 %s3386_s5, 4  ;;  %s3308_s8 = int_to_ptr.vmem [resolvable:$false] %s3307_s8 }
  0x7b   : > { %v1116_v43 = vadd.f32 %v1083_v36, %v1082_v35  ;;  %v1086_v56 = vmul.f32 %v3673_v52, %v3673_v52  ;;  %v3684_v58 = vld [vmem:[%s3590_s13 + $0x68] sm:$0xff]  ;;  %v3691_v61 = vld [vmem:[%s3590_s13 + $0x70] sm:$0xff]  ;;  %v3694_v63 = vld [vmem:[%s3590_s13 + $0x60] sm:$0xff]  ;;  %1114 = vadd.xlane.f32.xlu0 %v1113_v54  ;;  %v1093_v2 = vmul.f32 %v3687_v59, %v3687_v59  ;;  %v3706_v6 = vpack.c.bf16 %v3663_v46, %v3673_v52  ;;  %s3309_s10 = scalar_lea.vmem %s3308_s8, 4096  ;;  %p3310_p5 = scmp.lt.s32.totalorder %s4819_s24, %s3308_s8 }
  0x7c   : > { %2619 = vmatpush3.bf16.msra.mxu1 %v3096_v7  ;;  %620 = vmatpush1.bf16.msra.mxu0 %v3110_v27  ;;  %v3119_v60 = vld [vmem:[#allocation5 + $0x60] ss:$12 sps:$4 sm:$0xff]   ;;  %v3120_v62 = vld [vmem:[#allocation5 + $0x7c] ss:$12 sps:$4 sm:$0xff]   ;;  %v1125_v0 = vadd.f32 %v1089_v55, %v1088_v51  ;;  %v1092_v1 = vmul.f32 %v3691_v61, %v3691_v61  ;;  %v1090_v4 = vmul.f32 %v3694_v63, %v3694_v63  ;;  %v3768_v51 = vld [vmem:[%s3590_s13 + $0xd0] sm:$0xff]  ;;  %p3306_p3 = pneg %p3305_p1  ;;  %p3311_p9 = scmp.lt.s32.totalorder %s3309_s10, %s3303_s29 }
  0x7d   : > { %2620 = vmatprep.subr.bf16.mxu1 %v3097_v8  ;;  %621 = vmatprep.subr.bf16.mxu0 %v3111_v29  ;;  %v1122_v3 = vadd.f32 %v1087_v57, %v1086_v56  ;;  %v1091_v5 = vmul.f32 %v3684_v58, %v3684_v58  ;;  %v3709_v7 = vld [vmem:[%s3590_s13 + $0x98] sm:$0xff]  ;;  %v3743_v35 = vld [vmem:[%s3590_s13 + $0xa8] sm:$0xff]  ;;  %v3746_v36 = vld [vmem:[%s3590_s13 + $0xa0] sm:$0xff]  ;;  %v3758_v44 = vpack.c.bf16 %v3691_v61, %v3694_v63 }
  0x7e   : > { %1117 = vadd.xlane.f32.xlu1 %v1116_v43  ;;  %v3122_v8 = vld [vmem:[#allocation5 + $0x78] ss:$12 sps:$4 sm:$0xff]   ;;  %v3125_v27 = vld [vmem:[#allocation5 + $0x90] ss:$12 sps:$4 sm:$0xff]   ;;  %v1098_v42 = vmul.f32 %v3746_v36, %v3746_v36  ;;  %v1099_v43 = vmul.f32 %v3743_v35, %v3743_v35  ;;  %v3772_v54 = vld [vmem:[%s3590_s13 + $0xc8] sm:$0xff]  ;;  %v1104_v57 = vmul.f32 %v3768_v51, %v3768_v51  ;;  %p3312_p12 = por %p3311_p9, %p3310_p5 }
  0x7f   : > { %1123 = vadd.xlane.f32.xlu0 %v1122_v3  ;;  %v1128_v23 = vadd.f32 %v1091_v5, %v1090_v4  ;;  %v3737_v29 = vld [vmem:[%s3590_s13 + $0xb8] sm:$0xff]  ;;  %v3775_v55 = vld [vmem:[%s3590_s13 + $0xc0] sm:$0xff] }
  0x80   : > { %2621 = vmatpush3.bf16.msra.mxu1 %v3098_v9  ;;  %622 = vmatpush1.bf16.msra.mxu0 %v3113_v32  ;;  %v3713_v9 = vpack.c.bf16 %v3687_v59, %v3684_v58  ;;  %v3740_v32 = vld [vmem:[%s3590_s13 + $0xb0] sm:$0xff]  ;;  %v1101_v40 = vmul.f32 %v3737_v29, %v3737_v29  ;;  %v3132_v3 = vld [vmem:[#allocation5 + $0xdc] ss:$12 sps:$4 sm:$0xff]   ;;  %p3313_p2 = pnand %p3312_p12, %p3306_p3 }
  0x81   : > { %2622 = vmatprep.subr.bf16.mxu1 %v3099_v10  ;;  %623 = vmatprep.subr.bf16.mxu0 %v3114_v34  ;;  %v3716_v10 = vld [vmem:[%s3590_s13 + $0x90] sm:$0xff]  ;;  %v3126_v34 = vld [vmem:[#allocation5 + $0xac] ss:$12 sps:$4 sm:$0xff]   ;;  %v1100_v39 = vmul.f32 %v3740_v32, %v3740_v32 }
  0x82   : > { %1120 = vadd.xlane.f32.xlu1 %v1119_v53  ;;  %v3129_v53 = vld [vmem:[#allocation5 + $0xc4] ss:$12 sps:$4 sm:$0xff]  }
  0x83   : > { %1129 = vadd.xlane.f32.xlu0 %v1128_v23  ;;  %v1143_v56 = vadd.f32 %v1101_v40, %v1100_v39  ;;  %v3138_v23 = vld [vmem:[#allocation5 + $0x10c] ss:$12 sps:$4 sm:$0xff]   ;;  %v3144_v39 = vld [vmem:[#allocation5 + $0x13c] ss:$12 sps:$4 sm:$0xff]  }
  0x84   : > { %2623 = vmatpush3.bf16.msra.mxu1 %v3100_v14  ;;  %624 = vmatpush1.bf16.msra.mxu0 %v3116_v47  ;;  %v3720_v14 = vld [vmem:[%s3590_s13 + $0x88] sm:$0xff] }
  0x85   : > { %2624 = vmatprep.subr.bf16.mxu1 %v3101_v15  ;;  %625 = vmatprep.subr.bf16.mxu0 %v3117_v50  ;;  %v3723_v15 = vld [vmem:[%s3590_s13 + $0x80] sm:$0xff]  ;;  %v1095_v25 = vmul.f32 %v3720_v14, %v3720_v14  ;;  %v3128_v47 = vld [vmem:[#allocation5 + $0xa8] ss:$12 sps:$4 sm:$0xff]   ;;  %v3762_v48 = vpack.c.bf16 %v3709_v7, %v3720_v14  ;;  %v3765_v50 = vld [vmem:[%s3590_s13 + $0xd8] sm:$0xff] }
  0x86   : > { %1126 = vadd.xlane.f32.xlu1 %v1125_v0  ;;  %v1094_v24 = vmul.f32 %v3723_v15, %v3723_v15  ;;  %v1102_v0 = vmul.f32 %v3775_v55, %v3775_v55  ;;  %v3813_v40 = vld [vmem:[%s3590_s13 + $0xe8] sm:$0xff] }
  0x88   : > { %2625 = vmatpush3.bf16.msra.mxu1 %v3102_v16  ;;  %626 = vmatpush1.bf16.msra.mxu0 %v3119_v60  ;;  %v1131_v16 = vadd.f32 %v1093_v2, %v1092_v1  ;;  %v1134_v41 = vadd.f32 %v1095_v25, %v1094_v24  ;;  %v1105_v60 = vmul.f32 %v3765_v50, %v3765_v50  ;;  %v3131_v2 = vld [vmem:[#allocation5 + $0xc0] ss:$12 sps:$4 sm:$0xff]   ;;  %v3140_v25 = vld [vmem:[#allocation5 + $0x108] ss:$12 sps:$4 sm:$0xff]  }
  0x89   : > { %2626 = vmatprep.subr.bf16.mxu1 %v3103_v17  ;;  %627 = vmatprep.subr.bf16.mxu0 %v3120_v62  ;;  %v1096_v17 = vmul.f32 %v3716_v10, %v3716_v10  ;;  %v1140_v62 = vadd.f32 %v1099_v43, %v1098_v42  ;;  %v1103_v1 = vmul.f32 %v3772_v54, %v3772_v54  ;;  %v3146_v43 = vld [vmem:[#allocation5 + $0x138] ss:$12 sps:$4 sm:$0xff]  }
  0x8a   : > { %1132 = vadd.xlane.f32.xlu1 %v1131_v16  ;;  %1135 = vadd.xlane.f32.xlu0 %v1134_v41  ;;  %v1149_v4 = vadd.f32 %v1105_v60, %v1104_v57  ;;  %v3794_v16 = vpack.c.bf16 %v3737_v29, %v3743_v35  ;;  %v3802_v24 = vpack.c.bf16 %v3740_v32, %v3746_v36  ;;  %v3816_v41 = vld [vmem:[%s3590_s13 + $0xf8] sm:$0xff]  ;;  %v3831_v57 = vld [vmem:[%s3590_s13 + $0xe0] sm:$0xff]  ;;  %v3834_v60 = vld [vmem:[%s3590_s13 + $0xf0] sm:$0xff] }
  0x8b   : > { %v1146_v5 = vadd.f32 %v1103_v1, %v1102_v0  ;;  %v3820_v42 = vpack.c.bf16 %v3768_v51, %v3775_v55  ;;  %v295_v0 = vpack.c.bf16 %v3834_v60, %v3831_v57  ;;  %v3152_v1 = vld [vmem:[#allocation5 + $0x168] ss:$12 sps:$4 sm:$0xff]  }
  0x8c   : > { %2627 = vmatpush3.bf16.msra.mxu1 %v3104_v18  ;;  %v1097_v18 = vmul.f32 %v3709_v7, %v3709_v7  ;;  %628 = vmatpush1.bf16.msra.mxu0 %v3122_v8  ;;  %v3790_v8 = vpack.c.bf16 %v3716_v10, %v3723_v15 }
  0x8d   : > { %2965 = vmatprep.subr.bf16.mxu1 %v282_v13  ;;  %v3123_v13 = vld [vmem:[#allocation5 + $0x94] ss:$12 sps:$4 sm:$0xff]  }
  0x8e   : > { %629 = vmatprep.subr.bf16.mxu0 %v3123_v13  ;;  %v1137_v37 = vadd.f32 %v1097_v18, %v1096_v17  ;;  %1141 = vadd.xlane.f32.xlu0 %v1140_v62  ;;  %v3134_v13 = vld [vmem:[#allocation5 + $0xd8] ss:$12 sps:$4 sm:$0xff]   ;;  %v3135_v17 = vld [vmem:[#allocation5 + $0xf4] ss:$12 sps:$4 sm:$0xff]   ;;  %v3137_v18 = vld [vmem:[#allocation5 + $0xf0] ss:$12 sps:$4 sm:$0xff]  }
  0x8f   : > { %763 = vmatmul.mubr.bf16.vlgmr.msra.gmra.mrb[0].mxu1 %v3622_v26  ;;  %v3150_v62 = vld [vmem:[#allocation5 + $0x16c] ss:$12 sps:$4 sm:$0xff]  }
  0x90   : > { %770 = vmatprep.mubr.bf16.mxu1 %v3626_v28  ;;  %630 = vmatpush1.bf16.msra.mxu0 %v3125_v27  ;;  %v3806_v27 = vpack.c.bf16 %v3765_v50, %v3772_v54 }
  0x91   : > { %631 = vmatprep.subr.bf16.mxu0 %v3126_v34  ;;  %1138 = vadd.xlane.f32.xlu1 %v1137_v37  ;;  %v3141_v34 = vld [vmem:[#allocation5 + $0x124] ss:$12 sps:$4 sm:$0xff]   ;;  %v3143_v37 = vld [vmem:[#allocation5 + $0x120] ss:$12 sps:$4 sm:$0xff]  }
  0x92   : > { %1147 = vadd.xlane.f32.xlu0 %v1146_v5 }
  0x94   : > { %632 = vmatpush1.bf16.msra.mxu0 %v3128_v47  ;;  %v3824_v47 = vpack.c.bf16 %v3816_v41, %v3813_v40 }
  0x95   : > { %2967 = vmatpush1.bf16.xpose.msra.mxu1 %v3622_v26  ;;  %633 = vmatprep.subr.bf16.mxu0 %v3129_v53  ;;  %v3147_v53 = vld [vmem:[#allocation5 + $0x154] ss:$12 sps:$4 sm:$0xff]  }
  0x96   : > { %2969 = vmatprep.subr.bf16.mxu1 %v3626_v28  ;;  %1144 = vadd.xlane.f32.xlu1 %v1143_v56  ;;  %v3149_v56 = vld [vmem:[#allocation5 + $0x150] ss:$12 sps:$4 sm:$0xff]  }
  0x97   : > { %771 = vmatmul.mubr.bf16.gmra.mrb[4].mxu1 %v3660_v45 }
  0x98   : > { %778 = vmatprep.mubr.bf16.mxu1 %v3667_v49  ;;  %634 = vmatpush1.bf16.msra.mxu0 %v3131_v2 }
  0x99   : > { %635 = vmatprep.subr.bf16.mxu0 %v3132_v3 }
  0x9a   : > { %1150 = vadd.xlane.f32.xlu1 %v1149_v4 }
  0x9c   : > { %636 = vmatpush1.bf16.msra.mxu0 %v3134_v13 }
  0x9d   : > { %2971 = vmatpush1.bf16.xpose.msra.mxu1 %v3660_v45  ;;  %637 = vmatprep.subr.bf16.mxu0 %v3135_v17 }
  0x9e   : > { %2973 = vmatprep.subr.bf16.mxu1 %v3667_v49 }
  0x9f   : > { %779 = vmatmul.mubr.bf16.gmra.mrb[8].mxu1 %v3706_v6 }
  0xa0   : > { %786 = vmatprep.mubr.bf16.mxu1 %v3713_v9  ;;  %638 = vmatpush1.bf16.msra.mxu0 %v3137_v18 }
  0xa1   : > { %639 = vmatprep.subr.bf16.mxu0 %v3138_v23 }
  0xa4   : > { %640 = vmatpush1.bf16.msra.mxu0 %v3140_v25 }
  0xa5   : > { %2975 = vmatpush1.bf16.xpose.msra.mxu1 %v3706_v6  ;;  %641 = vmatprep.subr.bf16.mxu0 %v3141_v34 }
  0xa6   : > { %2977 = vmatprep.subr.bf16.mxu1 %v3713_v9 }
  0xa7   : > { %787 = vmatmul.mubr.bf16.gmra.mrb[12].mxu1 %v3758_v44 }
  0xa8   : > { %794 = vmatprep.mubr.bf16.mxu1 %v3762_v48  ;;  %642 = vmatpush1.bf16.msra.mxu0 %v3143_v37 }
  0xa9   : > { %643 = vmatprep.subr.bf16.mxu0 %v3144_v39 }
  0xac   : > { %644 = vmatpush1.bf16.msra.mxu0 %v3146_v43 }
  0xad   : > { %2979 = vmatpush1.bf16.xpose.msra.mxu1 %v3758_v44  ;;  %645 = vmatprep.subr.bf16.mxu0 %v3147_v53 }
  0xae   : > { %2981 = vmatprep.subr.bf16.mxu1 %v3762_v48 }
  0xaf   : > { %795 = vmatmul.mubr.bf16.gmra.mrb[16].mxu1 %v3790_v8 }
  0xb0   : > { %802 = vmatprep.mubr.bf16.mxu1 %v3794_v16  ;;  %646 = vmatpush1.bf16.msra.mxu0 %v3149_v56 }
  0xb1   : > { %647 = vmatprep.subr.bf16.mxu0 %v3150_v62  ;;  %v4875_v62 = vmov 0.0  }
  0xb4   : > { %648 = vmatpush1.bf16.msra.mxu0 %v3152_v1 }
  0xb5   : > { %2983 = vmatpush1.bf16.xpose.msra.mxu1 %v3790_v8 }
  0xb6   : > { %2985 = vmatprep.subr.bf16.mxu1 %v3794_v16 }
  0xb7   : > { %803 = vmatmul.mubr.bf16.gmra.mrb[20].mxu1 %v3802_v24  ;;  %650 = vmatmul.mubr.bf16.vlgmr.msra.gmra.mrb[0].mxu0 %v3622_v26 }
  0xb8   : > { %810 = vmatprep.mubr.bf16.mxu1 %v3806_v27  ;;  %659 = vmatprep.mubr.bf16.mxu0 %v3626_v28 }
  0xbd   : > { %2987 = vmatpush1.bf16.xpose.msra.mxu1 %v3802_v24 }
  0xbe   : > { %2989 = vmatprep.subr.bf16.mxu1 %v3806_v27 }
  0xbf   : > { %811 = vmatmul.mubr.bf16.gmra.mrb[24].mxu1 %v3820_v42  ;;  %660 = vmatmul.mubr.bf16.gmra.mrb[4].mxu0 %v3660_v45 }
  0xc0   : > { %818 = vmatprep.mubr.bf16.mxu1 %v3824_v47  ;;  %669 = vmatprep.mubr.bf16.mxu0 %v3667_v49 }
  0xc5   : > { %2991 = vmatpush1.bf16.xpose.msra.mxu1 %v3820_v42 }
  0xc6   : > { %2993 = vmatprep.subr.bf16.mxu1 %v3824_v47 }
  0xc7   : > { %819 = vmatmul.mubr.bf16.gmra.mrb[28].mxu1 %v295_v0  ;;  %670 = vmatmul.mubr.bf16.gmra.mrb[8].mxu0 %v3706_v6 }
  0xc8   : > { %997 = vmatprep.mubr.f32.mxu1 %v3601_v11  ;;  %679 = vmatprep.mubr.bf16.mxu0 %v3713_v9  ;;  %v1108_v11 = vmul.f32 %v3834_v60, %v3834_v60 }
  0xcd   : > { %2995 = vmatpush1.bf16.xpose.msra.mxu1 %v295_v0 }
  0xcf   : > { %680 = vmatmul.mubr.bf16.gmra.mrb[12].mxu0 %v3758_v44 }
  0xd0   : > { %689 = vmatprep.mubr.bf16.mxu0 %v3762_v48 }
  0xd4   : > { %998 = vmatmul.mubr.f32.vlgmr.msra.gmra.mrb[32].mxu1 %v3609_v19  ;;  %v1106_v19 = vmul.f32 %v3831_v57, %v3831_v57 }
  0xd5   : > { %1002 = vmatprep.mubr.f32.mxu1 %v3604_v12  ;;  %v1109_v12 = vmul.f32 %v3816_v41, %v3816_v41 }
  0xd7   : > { %690 = vmatmul.mubr.bf16.gmra.mrb[16].mxu0 %v3790_v8 }
  0xd8   : > { %1003 = vmatmul.mubr.f32.gmra.mrb[34].mxu1 %v3612_v20  ;;  %v1107_v20 = vmul.f32 %v3813_v40, %v3813_v40  ;;  %699 = vmatprep.mubr.bf16.mxu0 %v3794_v16 }
  0xd9   : > { %1007 = vmatprep.mubr.f32.mxu1 %v3615_v21  ;;  %v1155_v21 = vadd.f32 %v1109_v12, %v1108_v11 }
  0xdb   : > { %1156 = vadd.xlane.f32.xlu1 %v1155_v21 }
  0xdc   : > { %1008 = vmatmul.mubr.f32.gmra.mrb[36].mxu1 %v3629_v30 }
  0xdd   : > { %1012 = vmatprep.mubr.f32.mxu1 %v3618_v22  ;;  %v1152_v22 = vadd.f32 %v1107_v20, %v1106_v19 }
  0xdf   : > { %1153 = vadd.xlane.f32.xlu0 %v1152_v22  ;;  %700 = vmatmul.mubr.bf16.gmra.mrb[20].mxu0 %v3802_v24 }
  0xe0   : > { %1013 = vmatmul.mubr.f32.gmra.mrb[38].mxu1 %v3633_v31  ;;  %709 = vmatprep.mubr.bf16.mxu0 %v3806_v27 }
  0xe1   : > { %1017 = vmatprep.mubr.f32.mxu1 %v3637_v33 }
  0xe4   : > { %1018 = vmatmul.mubr.f32.gmra.mrb[40].mxu1 %v3673_v52 }
  0xe5   : > { %1022 = vmatprep.mubr.f32.mxu1 %v3646_v38 }
  0xe7   : > { %710 = vmatmul.mubr.bf16.gmra.mrb[24].mxu0 %v3820_v42 }
  0xe8   : > { %1023 = vmatmul.mubr.f32.gmra.mrb[42].mxu1 %v3663_v46  ;;  %719 = vmatprep.mubr.bf16.mxu0 %v3824_v47 }
  0xe9   : > { %1027 = vmatprep.mubr.f32.mxu1 %v3684_v58 }
  0xec   : > { %1028 = vmatmul.mubr.f32.gmra.mrb[44].mxu1 %v3694_v63 }
  0xed   : > { %1032 = vmatprep.mubr.f32.mxu1 %v3687_v59 }
  0xef   : > { %720 = vmatmul.mubr.bf16.gmra.mrb[28].mxu0 %v295_v0 }
  0xf0   : > { %1033 = vmatmul.mubr.f32.gmra.mrb[46].mxu1 %v3691_v61 }
  0xf1   : > { %1037 = vmatprep.mubr.f32.mxu1 %v3720_v14 }
  0xf4   : > { %1038 = vmatmul.mubr.f32.gmra.mrb[48].mxu1 %v3723_v15 }
  0xf5   : > { %1042 = vmatprep.mubr.f32.mxu1 %v3709_v7 }
  0xf8   : > { %1043 = vmatmul.mubr.f32.gmra.mrb[50].mxu1 %v3716_v10 }
  0xf9   : > { %1047 = vmatprep.mubr.f32.mxu1 %v3743_v35 }
  0xfc   : > { %1048 = vmatmul.mubr.f32.gmra.mrb[52].mxu1 %v3746_v36 }
  0xfd   : > { %1052 = vmatprep.mubr.f32.mxu1 %v3737_v29 }
 0x100   : > { %1053 = vmatmul.mubr.f32.gmra.mrb[54].mxu1 %v3740_v32 }
 0x101   : > { %1057 = vmatprep.mubr.f32.mxu1 %v3772_v54 }
 0x104   : > { %1058 = vmatmul.mubr.f32.gmra.mrb[56].mxu1 %v3775_v55 }
 0x105   : > { %1062 = vmatprep.mubr.f32.mxu1 %v3765_v50 }
 0x108   : > { %1063 = vmatmul.mubr.f32.gmra.mrb[58].mxu1 %v3768_v51 }
 0x109   : > { %1067 = vmatprep.mubr.f32.mxu1 %v3813_v40  ;;  %v866_v40 = vlaneseq }
 0x10b   : > { %v3926_v43 = vshrl.u32 %v866_v40, 7  ;;  %v3928_v47 = vand.u32 127, %v866_v40 }
 0x10c   : > { %1068 = vmatmul.mubr.f32.gmra.mrb[60].mxu1 %v3831_v57 }
 0x10d   : > { %1072 = vmatprep.mubr.f32.mxu1 %v3816_v41  ;;  %v868_v53 = vadd.s32 8, %v3926_v43  ;;  %vm885_vm0 = vcmp.eq.s32.totalorder %v3926_v43, %v3928_v47  ;;  %v869_v56 = vadd.s32 16, %v3926_v43  ;;  %v870_v11 = vadd.s32 24, %v3926_v43 }
 0x10e   : > { %v3938_v0 = vsel %vm885_vm0, 1.0, %v4875_v62  ;;  %vm2289_vm0 = vcmask 523264  }
 0x10f   : > { %vm886_vm1 = vcmp.eq.s32.totalorder %v868_v53, %v3928_v47  ;;  %4954 = vst [vmem:[#allocation28_spill] sm:$0xff] %v3938_v0  ;;  %vm887_vm2 = vcmp.eq.s32.totalorder %v869_v56, %v3928_v47  ;;  %vm888_vm3 = vcmp.eq.s32.totalorder %v870_v11, %v3928_v47 }
 0x110   : > { %1073 = vmatmul.mubr.f32.gmra.mrb[62].mxu1 %v3834_v60  ;;  %v3941_v1 = vsel %vm886_vm1, 1.0, %v4875_v62  ;;  %vm2402_vm1 = vcmask 1048064  }
 0x111   : > { %4955 = vst [vmem:[#allocation29_spill] sm:$0xff] %v3941_v1 }
 0x162   : > { %v2628_v26 = vpop.f32.mrb[0].mxu1 }
 0x163   : > { %v2629_v28 = vpop.f32.mrb[1].mxu1 }
 0x164   : > { %v3894_v30 = vadd.f32 %v2629_v28, %v2628_v26  ;;  %v2631_v31 = vpop.f32.mrb[2].mxu1  ;;  %v3954_v26 = vsel %vm887_vm2, 1.0, %v4875_v62 }
 0x165   : > { %v2632_v33 = vpop.f32.mrb[3].mxu1  ;;  %4957 = vst [vmem:[#allocation31_spill] sm:$0xff] %v3954_v26 }
 0x166   : > { %4938 = vst [vmem:[#allocation12_spill] sm:$0xff] %v3894_v30  ;;  %v3896_v38 = vadd.f32 %v2632_v33, %v2631_v31  ;;  %v871_v31 = vadd.s32 32, %v3926_v43 }
 0x168   : > { %4939 = vst [vmem:[#allocation13_spill] sm:$0xff] %v3896_v38  ;;  %vm889_vm4 = vcmp.eq.s32.totalorder %v871_v31, %v3928_v47 }
 0x16a   : > { %v2634_v45 = vpop.f32.mrb[4].mxu1 }
 0x16b   : > { %v2635_v46 = vpop.f32.mrb[5].mxu1 }
 0x16c   : > { %v3898_v49 = vadd.f32 %v2635_v46, %v2634_v45  ;;  %v2637_v52 = vpop.f32.mrb[6].mxu1 }
 0x16d   : > { %v2638_v58 = vpop.f32.mrb[7].mxu1 }
 0x16e   : > { %4940 = vst [vmem:[#allocation14_spill] sm:$0xff] %v3898_v49  ;;  %v3900_v59 = vadd.f32 %v2638_v58, %v2637_v52  ;;  %v3965_v58 = vsel %vm888_vm3, 1.0, %v4875_v62 }
 0x16f   : > { %4959 = vst [vmem:[#allocation33_spill] sm:$0xff] %v3965_v58 }
 0x170   : > { %4941 = vst [vmem:[#allocation15_spill] sm:$0xff] %v3900_v59 }
 0x172   : > { %v2640_v61 = vpop.f32.mrb[8].mxu1 }
 0x173   : > { %v2641_v63 = vpop.f32.mrb[9].mxu1 }
 0x174   : > { %v3902_v6 = vadd.f32 %v2641_v63, %v2640_v61  ;;  %v2643_v7 = vpop.f32.mrb[10].mxu1 }
 0x175   : > { %v2644_v9 = vpop.f32.mrb[11].mxu1 }
 0x176   : > { %4942 = vst [vmem:[#allocation16_spill] sm:$0xff] %v3902_v6  ;;  %v3904_v10 = vadd.f32 %v2644_v9, %v2643_v7  ;;  %v872_v7 = vadd.s32 40, %v3926_v43 }
 0x178   : > { %4943 = vst [vmem:[#allocation17_spill] sm:$0xff] %v3904_v10  ;;  %vm890_vm5 = vcmp.eq.s32.totalorder %v872_v7, %v3928_v47 }
 0x17a   : > { %v2646_v14 = vpop.f32.mrb[12].mxu1 }
 0x17b   : > { %v2647_v15 = vpop.f32.mrb[13].mxu1 }
 0x17c   : > { %v3906_v29 = vadd.f32 %v2647_v15, %v2646_v14  ;;  %v2649_v32 = vpop.f32.mrb[14].mxu1 }
 0x17d   : > { %v2650_v35 = vpop.f32.mrb[15].mxu1 }
 0x17e   : > { %4944 = vst [vmem:[#allocation18_spill] sm:$0xff] %v3906_v29  ;;  %v3908_v36 = vadd.f32 %v2650_v35, %v2649_v32 }
 0x180   : > { %4945 = vst [vmem:[#allocation19_spill] sm:$0xff] %v3908_v36 }
 0x182   : > { %v2652_v44 = vpop.f32.mrb[16].mxu1 }
 0x183   : > { %v2653_v48 = vpop.f32.mrb[17].mxu1 }
 0x184   : > { %v3910_v50 = vadd.f32 %v2653_v48, %v2652_v44  ;;  %v2655_v51 = vpop.f32.mrb[18].mxu1 }
 0x185   : > { %v2656_v54 = vpop.f32.mrb[19].mxu1 }
 0x186   : > { %4946 = vst [vmem:[#allocation20_spill] sm:$0xff] %v3910_v50  ;;  %v3912_v55 = vadd.f32 %v2656_v54, %v2655_v51  ;;  %v3984_v51 = vsel %vm889_vm4, 1.0, %v4875_v62 }
 0x187   : > { %4964 = vst [vmem:[#allocation38_spill] sm:$0xff] %v3984_v51 }
 0x188   : > { %4947 = vst [vmem:[#allocation21_spill] sm:$0xff] %v3912_v55 }
 0x18a   : > { %v2658_v2 = vpop.f32.mrb[20].mxu1  ;;  %v3951_v22 = vpop.f32.mrb[0].mxu0 }
 0x18b   : > { %v2659_v3 = vpop.f32.mrb[21].mxu1  ;;  %4956 = vst [vmem:[#allocation30_spill] sm:$0xff] %v3951_v22  ;;  %v3962_v52 = vpop.f32.mrb[1].mxu0 }
 0x18c   : > { %v3914_v4 = vadd.f32 %v2659_v3, %v2658_v2  ;;  %v2661_v5 = vpop.f32.mrb[22].mxu1  ;;  %4958 = vst [vmem:[#allocation32_spill] sm:$0xff] %v3962_v52  ;;  %v3967_v61 = vpop.f32.mrb[2].mxu0  ;;  %v873_v3 = vadd.s32 48, %v3926_v43 }
 0x18d   : > { %v2662_v8 = vpop.f32.mrb[23].mxu1  ;;  %4960 = vst [vmem:[#allocation34_spill] sm:$0xff] %v3967_v61  ;;  %v3971_v9 = vpop.f32.mrb[3].mxu0 }
 0x18e   : > { %4948 = vst [vmem:[#allocation22_spill] sm:$0xff] %v3914_v4  ;;  %v3916_v13 = vadd.f32 %v2662_v8, %v2661_v5  ;;  %4961 = vst [vmem:[#allocation35_spill] sm:$0xff] %v3971_v9  ;;  %vm891_vm6 = vcmp.eq.s32.totalorder %v873_v3, %v3928_v47 }
 0x190   : > { %4949 = vst [vmem:[#allocation23_spill] sm:$0xff] %v3916_v13 }
 0x192   : > { %v2664_v16 = vpop.f32.mrb[24].mxu1  ;;  %v3977_v32 = vpop.f32.mrb[4].mxu0 }
 0x193   : > { %v2665_v17 = vpop.f32.mrb[25].mxu1  ;;  %4962 = vst [vmem:[#allocation36_spill] sm:$0xff] %v3977_v32  ;;  %v3981_v48 = vpop.f32.mrb[5].mxu0 }
 0x194   : > { %v3918_v18 = vadd.f32 %v2665_v17, %v2664_v16  ;;  %v2667_v23 = vpop.f32.mrb[26].mxu1  ;;  %4963 = vst [vmem:[#allocation37_spill] sm:$0xff] %v3981_v48  ;;  %v3986_v54 = vpop.f32.mrb[6].mxu0 }
 0x195   : > { %v2668_v24 = vpop.f32.mrb[27].mxu1  ;;  %4965 = vst [vmem:[#allocation39_spill] sm:$0xff] %v3986_v54  ;;  %v3990_v5 = vpop.f32.mrb[7].mxu0 }
 0x196   : > { %4950 = vst [vmem:[#allocation24_spill] sm:$0xff] %v3918_v18  ;;  %v3920_v25 = vadd.f32 %v2668_v24, %v2667_v23  ;;  %4966 = vst [vmem:[#allocation40_spill] sm:$0xff] %v3990_v5 }
 0x198   : > { %4951 = vst [vmem:[#allocation25_spill] sm:$0xff] %v3920_v25 }
 0x19a   : > { %v2670_v27 = vpop.f32.mrb[28].mxu1  ;;  %v3996_v17 = vpop.f32.mrb[8].mxu0 }
 0x19b   : > { %v2671_v34 = vpop.f32.mrb[29].mxu1  ;;  %4967 = vst [vmem:[#allocation41_spill] sm:$0xff] %v3996_v17 }
 0x19c   : > { %v3922_v37 = vadd.f32 %v2671_v34, %v2670_v27  ;;  %v2673_v39 = vpop.f32.mrb[30].mxu1  ;;  %v4000_v27 = vpop.f32.mrb[9].mxu0  ;;  %v4003_v34 = vsel %vm890_vm5, 1.0, %v4875_v62 }
 0x19d   : > { %v2674_v41 = vpop.f32.mrb[31].mxu1  ;;  %4968 = vst [vmem:[#allocation42_spill] sm:$0xff] %v4000_v27  ;;  %4969 = vst [vmem:[#allocation43_spill] sm:$0xff] %v4003_v34 }
 0x19e   : > { %4952 = vst [vmem:[#allocation26_spill] sm:$0xff] %v3922_v37  ;;  %v3924_v42 = vadd.f32 %v2674_v41, %v2673_v39  ;;  %v4005_v39 = vpop.f32.mrb[10].mxu0  ;;  %v874_v41 = vadd.s32 56, %v3926_v43 }
 0x19f   : > { %4970 = vst [vmem:[#allocation44_spill] sm:$0xff] %v4005_v39  ;;  %v4009_v53 = vpop.f32.mrb[11].mxu0 }
 0x1a0   : > { %4953 = vst [vmem:[#allocation27_spill] sm:$0xff] %v3924_v42  ;;  %4971 = vst [vmem:[#allocation45_spill] sm:$0xff] %v4009_v53  ;;  %vm892_vm7 = vcmp.eq.s32.totalorder %v874_v41, %v3928_v47 }
 0x1a2   : > { %v4015_v11 = vpop.f32.mrb[12].mxu0 }
 0x1a3   : > { %4972 = vst [vmem:[#allocation46_spill] sm:$0xff] %v4015_v11  ;;  %v878_v11 = vadd.s32 88, %v3926_v43 }
 0x1a5   : > { %vm896_vm11 = vcmp.eq.s32.totalorder %v878_v11, %v3928_v47 }
 0x1a7   : > { %v3935_v57 = vpop.f32.mrb[32].mxu1 }
 0x1a8   : > { %v1001_v60 = vpop.f32.mrb[33].mxu1  ;;  %v1158_v19 = vmul.f32 %v3938_v0, %v3935_v57 }
 0x1ab   : > { %v3945_v12 = vpop.f32.mrb[34].mxu1 }
 0x1ac   : > { %v1159_v20 = vmul.f32 %v3941_v1, %v3945_v12  ;;  %v1006_v21 = vpop.f32.mrb[35].mxu1 }
 0x1ad   : > { %v4019_v21 = vpop.f32.mrb[13].mxu0 }
 0x1ae   : > { %v1174_v28 = vadd.f32 %v1159_v20, %v1158_v19  ;;  %4973 = vst [vmem:[#allocation47_spill] sm:$0xff] %v4019_v21  ;;  %v4024_v31 = vpop.f32.mrb[14].mxu0 }
 0x1af   : > { %v3958_v33 = vpop.f32.mrb[36].mxu1  ;;  %4975 = vst [vmem:[#allocation49_spill] sm:$0xff] %v4024_v31 }
 0x1b0   : > { %v1160_v45 = vmul.f32 %v3954_v26, %v3958_v33  ;;  %v1011_v46 = vpop.f32.mrb[37].mxu1 }
 0x1b1   : > { %v875_v46 = vadd.s32 64, %v3926_v43 }
 0x1b2   : > { %v1175_v63 = vadd.f32 %v1174_v28, %v1160_v45  ;;  %v4022_v28 = vsel %vm891_vm6, 1.0, %v4875_v62 }
 0x1b3   : > { %v3973_v14 = vpop.f32.mrb[38].mxu1  ;;  %4974 = vst [vmem:[#allocation48_spill] sm:$0xff] %v4022_v28  ;;  %vm893_vm8 = vcmp.eq.s32.totalorder %v875_v46, %v3928_v47 }
 0x1b4   : > { %v1161_v35 = vmul.f32 %v3965_v58, %v3973_v14  ;;  %v1016_v44 = vpop.f32.mrb[39].mxu1  ;;  %v4056_v16 = vsel %vm893_vm8, 1.0, %v4875_v62 }
 0x1b5   : > { %4982 = vst [vmem:[#allocation56_spill] sm:$0xff] %v4056_v16 }
 0x1b6   : > { %v1176_v2 = vadd.f32 %v1175_v63, %v1161_v35  ;;  %v4028_v63 = vpop.f32.mrb[15].mxu0 }
 0x1b7   : > { %v3992_v8 = vpop.f32.mrb[40].mxu1  ;;  %4976 = vst [vmem:[#allocation50_spill] sm:$0xff] %v4028_v63  ;;  %v4034_v44 = vpop.f32.mrb[16].mxu0 }
 0x1b8   : > { %v1162_v23 = vmul.f32 %v3984_v51, %v3992_v8  ;;  %v1021_v24 = vpop.f32.mrb[41].mxu1  ;;  %4977 = vst [vmem:[#allocation51_spill] sm:$0xff] %v4034_v44  ;;  %v4064_v44 = vpop.xlane.xlu0 %1111 }
 0x1b9   : > { %v4041_v24 = vsel %vm892_vm7, 1.0, %v4875_v62 }
 0x1ba   : > { %v1177_v40 = vadd.f32 %v1176_v2, %v1162_v23  ;;  %v4038_v23 = vpop.f32.mrb[17].mxu0  ;;  %4979 = vst [vmem:[#allocation53_spill] sm:$0xff] %v4041_v24 }
 0x1bb   : > { %v4011_v56 = vpop.f32.mrb[42].mxu1  ;;  %4978 = vst [vmem:[#allocation52_spill] sm:$0xff] %v4038_v23 }
 0x1bc   : > { %v1163_v19 = vmul.f32 %v4003_v34, %v4011_v56  ;;  %v1026_v20 = vpop.f32.mrb[43].mxu1 }
 0x1be   : > { %v1178_v45 = vadd.f32 %v1177_v40, %v1163_v19  ;;  %v4043_v40 = vpop.f32.mrb[18].mxu0  ;;  %v876_v19 = vadd.s32 72, %v3926_v43 }
 0x1bf   : > { %v4030_v7 = vpop.f32.mrb[44].mxu1  ;;  %4980 = vst [vmem:[#allocation54_spill] sm:$0xff] %v4043_v40  ;;  %v4047_v20 = vpop.f32.mrb[19].mxu0 }
 0x1c0   : > { %v1164_v2 = vmul.f32 %v4022_v28, %v4030_v7  ;;  %v1031_v3 = vpop.f32.mrb[45].mxu1  ;;  %4981 = vst [vmem:[#allocation55_spill] sm:$0xff] %v4047_v20  ;;  %v4058_v40 = vpop.xlane.xlu1 %1117  ;;  %vm894_vm9 = vcmp.eq.s32.totalorder %v876_v19, %v3928_v47 }
 0x1c2   : > { %v1179_v41 = vadd.f32 %v1178_v45, %v1164_v2  ;;  %v4060_v45 = vpop.f32.mrb[20].mxu0  ;;  %v877_v2 = vadd.s32 80, %v3926_v43 }
 0x1c3   : > { %v4049_v35 = vpop.f32.mrb[46].mxu1  ;;  %4983 = vst [vmem:[#allocation57_spill] sm:$0xff] %v4060_v45  ;;  %v4066_v39 = vpop.f32.mrb[21].mxu0  ;;  %v4987_v45 = vmov 0.0  }
 0x1c4   : > { %v1165_v3 = vmul.f32 %v4041_v24, %v4049_v35  ;;  %v1036_v60 = vpop.f32.mrb[47].mxu1  ;;  %4984 = vst [vmem:[#allocation58_spill] sm:$0xff] %v4066_v39  ;;  %v4070_v31 = vpop.f32.mrb[22].mxu0  ;;  %vm895_vm10 = vcmp.eq.s32.totalorder %v877_v2, %v3928_v47  ;;  %v4106_v34 = vsel %vm896_vm11, 1.0, %v4987_v45 }
 0x1c5   : > { %4985 = vst [vmem:[#allocation59_spill] sm:$0xff] %v4070_v31  ;;  %v4074_v17 = vpop.f32.mrb[23].mxu0  ;;  %v4090_v22 = vpop.xlane.xlu1 %1120  ;;  %4994 = vst [vmem:[#allocation67_spill] sm:$0xff] %v4106_v34 }
 0x1c6   : > { %v1180_v46 = vadd.f32 %v1179_v41, %v1165_v3  ;;  %4986 = vst [vmem:[#allocation60_spill] sm:$0xff] %v4074_v17  ;;  %v4077_v41 = vsel %vm894_vm9, 1.0, %v4987_v45  ;;  %v4092_v32 = vpop.f32.mrb[24].mxu0  ;;  %v4096_v2 = vpop.xlane.xlu0 %1114 }
 0x1c7   : > { %v4068_v15 = vpop.f32.mrb[48].mxu1  ;;  %4988 = vst [vmem:[#allocation61_spill] sm:$0xff] %v4077_v41  ;;  %4990 = vst [vmem:[#allocation63_spill] sm:$0xff] %v4092_v32 }
 0x1c8   : > { %v1166_v60 = vmul.f32 %v4056_v16, %v4068_v15  ;;  %v1041_v62 = vpop.f32.mrb[49].mxu1 }
 0x1c9   : > { %v4088_v62 = vsel %vm895_vm10, 1.0, %v4987_v45  ;;  %v4112_v51 = vpop.xlane.xlu1 %1126 }
 0x1ca   : > { %v1181_v3 = vadd.f32 %v1180_v46, %v1166_v60  ;;  %4989 = vst [vmem:[#allocation62_spill] sm:$0xff] %v4088_v62  ;;  %v879_v46 = vadd.s32 96, %v3926_v43  ;;  %v4098_v60 = vpop.f32.mrb[25].mxu0 }
 0x1cb   : > { %v4083_v61 = vpop.f32.mrb[50].mxu1  ;;  %4991 = vst [vmem:[#allocation64_spill] sm:$0xff] %v4098_v60  ;;  %v4100_v24 = vpop.f32.mrb[26].mxu0 }
 0x1cc   : > { %v1167_v31 = vmul.f32 %v4077_v41, %v4083_v61  ;;  %v1046_v54 = vpop.f32.mrb[51].mxu1  ;;  %4992 = vst [vmem:[#allocation65_spill] sm:$0xff] %v4100_v24  ;;  %v4103_v28 = vpop.f32.mrb[27].mxu0  ;;  %vm897_vm12 = vcmp.eq.s32.totalorder %v879_v46, %v3928_v47 }
 0x1cd   : > { %4993 = vst [vmem:[#allocation66_spill] sm:$0xff] %v4103_v28  ;;  %v4118_v58 = vsel %vm897_vm12, 1.0, %v4987_v45  ;;  %v4120_v26 = vpop.f32.mrb[28].mxu0  ;;  %v4134_v37 = vpop.xlane.xlu1 %1132 }
 0x1ce   : > { %v1182_v16 = vadd.f32 %v1181_v3, %v1167_v31  ;;  %v880_v3 = vadd.s32 104, %v3926_v43  ;;  %4995 = vst [vmem:[#allocation68_spill] sm:$0xff] %v4118_v58  ;;  %4996 = vst [vmem:[#allocation69_spill] sm:$0xff] %v4120_v26  ;;  %v4124_v46 = vpop.f32.mrb[29].mxu0 }
 0x1cf   : > { %v1049_v19 = vpop.f32.mrb[52].mxu1  ;;  %4997 = vst [vmem:[#allocation70_spill] sm:$0xff] %v4124_v46  ;;  %v4126_v11 = vpop.f32.mrb[30].mxu0 }
 0x1d0   : > { %v1168_v54 = vmul.f32 %v4088_v62, %v1049_v19  ;;  %v1051_v41 = vpop.f32.mrb[53].mxu1  ;;  %vm898_vm13 = vcmp.eq.s32.totalorder %v880_v3, %v3928_v47  ;;  %4998 = vst [vmem:[#allocation71_spill] sm:$0xff] %v4126_v11  ;;  %v4129_v0 = vpop.f32.mrb[31].mxu0  ;;  %v882_v11 = vadd.s32 120, %v3926_v43 }
 0x1d1   : > { %v4115_v41 = vpop.xlane.xlu0 %1123  ;;  %4999 = vst [vmem:[#allocation72_spill] sm:$0xff] %v4129_v0  ;;  %v4132_v42 = vsel %vm898_vm13, 1.0, %v4987_v45  ;;  %v1139_v4 = vpop.xlane.xlu1 %1138 }
 0x1d2   : > { %v1183_v31 = vadd.f32 %v1182_v16, %v1168_v54  ;;  %v881_v16 = vadd.s32 112, %v3926_v43  ;;  %5000 = vst [vmem:[#allocation73_spill] sm:$0xff] %v4132_v42  ;;  %vm900_vm15 = vcmp.eq.s32.totalorder %v882_v11, %v3928_v47 }
 0x1d3   : > { %v1054_v32 = vpop.f32.mrb[54].mxu1 }
 0x1d4   : > { %v1169_v24 = vmul.f32 %v4106_v34, %v1054_v32  ;;  %v1056_v62 = vpop.f32.mrb[55].mxu1  ;;  %vm899_vm14 = vcmp.eq.s32.totalorder %v881_v16, %v3928_v47 }
 0x1d5   : > { %v4139_v3 = vpop.xlane.xlu0 %1129  ;;  %v4144_v25 = vsel %vm899_vm14, 1.0, %v4987_v45  ;;  %v1145_v36 = vpop.xlane.xlu1 %1144 }
 0x1d6   : > { %v1184_v1 = vadd.f32 %v1183_v31, %v1169_v24  ;;  %5001 = vst [vmem:[#allocation74_spill] sm:$0xff] %v4144_v25  ;;  %v4149_v24 = vsel %vm900_vm15, 1.0, %v4987_v45  ;;  %v4156_v45 = vmul.f32 2.0, %v4083_v61 }
 0x1d7   : > { %v1059_v54 = vpop.f32.mrb[56].mxu1  ;;  %5002 = vst [vmem:[#allocation75_spill] sm:$0xff] %v4149_v24 }
 0x1d8   : > { %v1170_v34 = vmul.f32 %v4118_v58, %v1059_v54  ;;  %v1061_v62 = vpop.f32.mrb[57].mxu1 }
 0x1d9   : > { %v1136_v16 = vpop.xlane.xlu0 %1135  ;;  %v1151_v11 = vpop.xlane.xlu1 %1150 }
 0x1da   : > { %v1185_v31 = vadd.f32 %v1184_v1, %v1170_v34 }
 0x1db   : > { %v1064_v26 = vpop.f32.mrb[58].mxu1 }
 0x1dc   : > { %v1171_v62 = vmul.f32 %v4132_v42, %v1064_v26  ;;  %v1066_v58 = vpop.f32.mrb[59].mxu1 }
 0x1dd   : > { %v1142_v29 = vpop.xlane.xlu0 %1141 }
 0x1de   : > { %v1186_v18 = vadd.f32 %v1185_v31, %v1171_v62 }
 0x1df   : > { %v1069_v13 = vpop.f32.mrb[60].mxu1 }
 0x1e0   : > { %v1172_v1 = vmul.f32 %v4144_v25, %v1069_v13  ;;  %v1071_v34 = vpop.f32.mrb[61].mxu1 }
 0x1e1   : > { %v1148_v10 = vpop.xlane.xlu0 %1147  ;;  %v4153_v34 = vmul.f32 2.0, %v4068_v15 }
 0x1e2   : > { %v1187_v43 = vadd.f32 %v1186_v18, %v1172_v1  ;;  %v4158_v18 = vmul.f32 2.0, %v1049_v19  ;;  %v4160_v1 = vmul.f32 2.0, %v1054_v32 }
 0x1e3   : > { %v1074_v55 = vpop.f32.mrb[62].mxu1 }
 0x1e4   : > { %v1173_v42 = vmul.f32 %v4149_v24, %v1074_v55  ;;  %v1076_v58 = vpop.f32.mrb[63].mxu1  ;;  %v4162_v24 = vmul.f32 2.0, %v1059_v54 }
 0x1e5   : > { %v1154_v58 = vpop.xlane.xlu0 %1153 }
 0x1e6   : > { %v1188_v50 = vadd.f32 %v1187_v43, %v1173_v42  ;;  %v1157_v43 = vpop.xlane.xlu1 %1156 }
 0x1e8   : > { %v1189_v31 = vrot.slane %v1188_v50, 4 }
 0x1ea   : > { %v1190_v62 = vadd.f32 %v1189_v31, %v1188_v50  ;;  %v4164_v50 = vmul.f32 2.0, %v1064_v26  ;;  %v4166_v31 = vmul.f32 2.0, %v1069_v13 }
 0x1ec   : > { %v1191_v47 = vrot.slane %v1190_v62, 2 }
 0x1ee   : > { %v1192_v6 = vadd.f32 %v1191_v47, %v1190_v62  ;;  %v4168_v62 = vmul.f32 2.0, %v1074_v55 }
 0x1f0   : > { %v1193_v25 = vrot.slane %v1192_v6, 1 }
 0x1f2   : > { %v1194_v42 = vadd.f32 %v1193_v25, %v1192_v6 }
 0x1f4   : > { %v1204_v15 = vadd.f32 %v1194_v42, %v1139_v4  ;;  %v1203_v47 = vadd.f32 %v1194_v42, %v1136_v16  ;;  %v4170_v59 = vadd.f32 %v1194_v42, %v1145_v36  ;;  %v4172_v61 = vadd.f32 %v1194_v42, %v1142_v29 }
 0x1f5   : > { %v4174_v19 = vadd.f32 %v1194_v42, %v1151_v11  ;;  %v4176_v32 = vadd.f32 %v1194_v42, %v1148_v10  ;;  %v4178_v6 = vadd.f32 %v1194_v42, %v1157_v43  ;;  %v4180_v25 = vadd.f32 %v1194_v42, %v1154_v58 }
 0x1f6   : > { %v1236_v26 = vsub.f32 %v1204_v15, %v4156_v45  ;;  %v1235_v13 = vsub.f32 %v1203_v47, %v4153_v34  ;;  %v1238_v55 = vsub.f32 %v4170_v59, %v4160_v1  ;;  %v1237_v36 = vsub.f32 %v4172_v61, %v4158_v18 }
 0x1f7   : > { %v1212_v16 = vmul.f32 2.0, %v3945_v12  ;;  %v1196_v11 = vadd.f32 %v1194_v42, %v4096_v2  ;;  %v1211_v59 = vmul.f32 2.0, %v3935_v57  ;;  %v1195_v34 = vadd.f32 %v1194_v42, %v4064_v44 }
 0x1f8   : > { %v1213_v45 = vmul.f32 2.0, %v3958_v33  ;;  %v1214_v18 = vmul.f32 2.0, %v3973_v14  ;;  %v1215_v43 = vmul.f32 2.0, %v3992_v8  ;;  %v1198_v15 = vadd.f32 %v1194_v42, %v4090_v22 }
 0x1f9   : > { %v1228_v1 = vsub.f32 %v1196_v11, %v1212_v16  ;;  %v1227_v58 = vsub.f32 %v1195_v34, %v1211_v59  ;;  %v1197_v47 = vadd.f32 %v1194_v42, %v4058_v40  ;;  %v1216_v12 = vmul.f32 2.0, %v4011_v56 }
 0x1fa   : > { %v1200_v2 = vadd.f32 %v1194_v42, %v4112_v51  ;;  %v1199_v57 = vadd.f32 %v1194_v42, %v4115_v41  ;;  %v1230_v54 = vsub.f32 %v1198_v15, %v1214_v18  ;;  %v1217_v22 = vmul.f32 2.0, %v4030_v7 }
 0x1fb   : > { %v1244_v61 = vmax.f32 %v1228_v1, 0.0  ;;  %v1243_v44 = vmax.f32 %v1227_v58, 0.0  ;;  %v1229_v33 = vsub.f32 %v1197_v47, %v1213_v45  ;;  %v1218_v56 = vmul.f32 2.0, %v4049_v35 }
 0x1fc   : > { %v1232_v14 = vsub.f32 %v1200_v2, %v1216_v12  ;;  %v1231_v16 = vsub.f32 %v1199_v57, %v1215_v43  ;;  %v1246_v8 = vmax.f32 %v1230_v54, 0.0  ;;  %v1202_v45 = vadd.f32 %v1194_v42, %v4134_v37 }
 0x1fd   : > { %v1260_v4 = vmul.f32 -0.001953125, %v1244_v61  ;;  %v1259_v11 = vmul.f32 -0.001953125, %v1243_v44  ;;  %v1245_v59 = vmax.f32 %v1229_v33, 0.0  ;;  %v1201_v54 = vadd.f32 %v1194_v42, %v4139_v3 }
 0x1fe   : > { %v1248_v40 = vmax.f32 %v1232_v14, 0.0  ;;  %v1247_v10 = vmax.f32 %v1231_v16, 0.0  ;;  %v1262_v51 = vmul.f32 -0.001953125, %v1246_v8  ;;  %v1252_v15 = vmax.f32 %v1236_v26, 0.0  ;;  %v851_v14 = vld [vmem:[#allocation7 + $0x8] sm:$0xff] }
 0x1ff   : > { %v1277_v34 = vmul.f32 1.442695, %v1260_v4  ;;  %v1275_v1 = vmul.f32 1.442695, %v1259_v11  ;;  %v1261_v29 = vmul.f32 -0.001953125, %v1245_v59  ;;  %v1234_v4 = vsub.f32 %v1202_v45, %v1218_v56 }
 0x200   : > { %v1264_v41 = vmul.f32 -0.001953125, %v1248_v40  ;;  %v1263_v18 = vmul.f32 -0.001953125, %v1247_v10  ;;  %v1281_v43 = vmul.f32 1.442695, %v1262_v51  ;;  %v1251_v47 = vmax.f32 %v1235_v13, 0.0  ;;  %v850_v13 = vld [vmem:[#allocation7] sm:$0xff] }
 0x201   : > { %3153 = vpow2.f32 %v1277_v34  ;;  %v1279_v58 = vmul.f32 1.442695, %v1261_v29  ;;  %v1233_v35 = vsub.f32 %v1201_v54, %v1217_v22  ;;  %v1250_v61 = vmax.f32 %v1234_v4, 0.0  ;;  %v855_v4 = vld [vmem:[#allocation7 + $0x28] sm:$0xff] }
 0x202   : > { %3155 = vpow2.f32 %v1275_v1  ;;  %v1285_v7 = vmul.f32 1.442695, %v1264_v41  ;;  %v1283_v12 = vmul.f32 1.442695, %v1263_v18  ;;  %v1268_v57 = vmul.f32 -0.001953125, %v1252_v15  ;;  %v852_v18 = vld [vmem:[#allocation7 + $0x10] sm:$0xff] }
 0x203   : > { %3157 = vpow2.f32 %v1281_v43  ;;  %v1249_v2 = vmax.f32 %v1233_v35, 0.0  ;;  %v1254_v44 = vmax.f32 %v1238_v55, 0.0  ;;  %v1266_v10 = vmul.f32 -0.001953125, %v1250_v61 }
 0x204   : > { %3159 = vpow2.f32 %v1279_v58  ;;  %v1267_v37 = vmul.f32 -0.001953125, %v1251_v47  ;;  %v1253_v33 = vmax.f32 %v1237_v36, 0.0  ;;  %v5003_v42 = vsub.f32 %v4174_v19, %v4164_v50  ;;  %v853_v50 = vld [vmem:[#allocation7 + $0x18] sm:$0xff] }
 0x205   : > { %3161 = vpow2.f32 %v1285_v7  ;;  %v1265_v29 = vmul.f32 -0.001953125, %v1249_v2  ;;  %v1289_v3 = vmul.f32 1.442695, %v1266_v10  ;;  %v1293_v8 = vmul.f32 1.442695, %v1268_v57  ;;  %v857_v10 = vld [vmem:[#allocation7 + $0x38] sm:$0xff] }
 0x206   : > { %3163 = vpow2.f32 %v1283_v12  ;;  %v1256_v26 = vmax.f32 %v5003_v42, 0.0  ;;  %v1270_v59 = vmul.f32 -0.001953125, %v1254_v44  ;;  %v5004_v55 = vsub.f32 %v4176_v32, %v4162_v24  ;;  %v854_v12 = vld [vmem:[#allocation7 + $0x20] sm:$0xff] }
 0x207   : > { %v1287_v16 = vmul.f32 1.442695, %v1265_v29  ;;  %3165 = vpow2.f32 %v1289_v3  ;;  %v1291_v36 = vmul.f32 1.442695, %v1267_v37  ;;  %v1269_v40 = vmul.f32 -0.001953125, %v1253_v33  ;;  %v856_v33 = vld [vmem:[#allocation7 + $0x30] sm:$0xff] }
 0x208   : > { %v1255_v22 = vmax.f32 %v5004_v55, 0.0  ;;  %v5005_v51 = vsub.f32 %v4178_v6, %v4168_v62  ;;  %v1297_v32 = vmul.f32 1.442695, %v1270_v59  ;;  %v1272_v45 = vmul.f32 -0.001953125, %v1256_v26 }
 0x209   : > { %3167 = vpow2.f32 %v1287_v16  ;;  %v5006_v43 = vsub.f32 %v4180_v25, %v4166_v31  ;;  %v1295_v54 = vmul.f32 1.442695, %v1269_v40 }
 0x20a   : > { %v1258_v41 = vmax.f32 %v5005_v51, 0.0  ;;  %3169 = vpow2.f32 %v1293_v8  ;;  %v1271_v15 = vmul.f32 -0.001953125, %v1255_v22  ;;  %v1301_v35 = vmul.f32 1.442695, %v1272_v45  ;;  %v861_v22 = vld [vmem:[#allocation7 + $0x58] sm:$0xff]  ;;  %v863_v51 = vld [vmem:[#allocation7 + $0x68] sm:$0xff] }
 0x20b   : > { %v3154_v11 = vpop.eup %3153  ;;  %v1257_v58 = vmax.f32 %v5006_v43, 0.0  ;;  %3171 = vpow2.f32 %v1291_v36  ;;  %v860_v36 = vld [vmem:[#allocation7 + $0x50] sm:$0xff]  ;;  %v865_v43 = vld [vmem:[#allocation7 + $0x78] sm:$0xff] }
 0x20c   : > { %v3156_v34 = vpop.eup %3155  ;;  %v4218_v56 = vmul.f32 %v3154_v11, %v851_v14  ;;  %3173 = vpow2.f32 %v1297_v32  ;;  %v1274_v61 = vmul.f32 -0.001953125, %v1258_v41  ;;  %v1299_v31 = vmul.f32 1.442695, %v1271_v15  ;;  %v858_v11 = vld [vmem:[#allocation7 + $0x40] sm:$0xff] }
 0x20d   : > { %v4220_v1 = vmul.f32 %v3156_v34, %v850_v13  ;;  %v3158_v19 = vpop.eup %3157  ;;  %3175 = vpow2.f32 %v1295_v54  ;;  %v1273_v25 = vmul.f32 -0.001953125, %v1257_v58  ;;  %v859_v13 = vld [vmem:[#allocation7 + $0x48] sm:$0xff]  ;;  %v864_v54 = vld [vmem:[#allocation7 + $0x70] sm:$0xff] }
 0x20e   : > { %1325 = vadd.xlane.f32.xlu1 %v4218_v56  ;;  %v3160_v24 = vpop.eup %3159  ;;  %v4230_v7 = vmul.f32 %v3158_v19, %v853_v50  ;;  %3177 = vpow2.f32 %v1301_v35  ;;  %v1305_v29 = vmul.f32 1.442695, %v1274_v61  ;;  %v5010_v35 = vpack.c.bf16 %v4028_v63, %v4019_v21 }
 0x20f   : > { %1323 = vadd.xlane.f32.xlu0 %v4220_v1  ;;  %v3162_v62 = vpop.eup %3161  ;;  %v4232_v6 = vmul.f32 %v3160_v24, %v852_v18  ;;  %3179 = vpow2.f32 %v1299_v31  ;;  %v1303_v14 = vmul.f32 1.442695, %v1273_v25  ;;  %v862_v18 = vld [vmem:[#allocation7 + $0x60] sm:$0xff]  ;;  %v5011_v61 = vpack.c.bf16 %v4047_v20, %v4038_v23 }
 0x210   : > { %v3164_v47 = vpop.eup %3163  ;;  %v4236_v2 = vmul.f32 %v3162_v62, %v855_v4  ;;  %3181 = vpow2.f32 %v1305_v29  ;;  %v5007_v4 = vpack.c.bf16 %v3990_v5, %v3981_v48  ;;  %v5012_v31 = vpack.c.bf16 %v4074_v17, %v4066_v39  ;;  %v5016_v29 = vld [vmem:[#allocation16_spill] sm:$0xff]  ;;  %v5045_v17 = vld [vmem:[#allocation73_spill] sm:$0xff] }
 0x211   : > { %v3166_v57 = vpop.eup %3165  ;;  %v4238_v44 = vmul.f32 %v3164_v47, %v854_v12  ;;  %3183 = vpow2.f32 %v1303_v14  ;;  %v5008_v47 = vpack.c.bf16 %v4009_v53, %v4000_v27  ;;  %v5009_v12 = vpack.c.bf16 %v3971_v9, %v3962_v52  ;;  %v5017_v14 = vld [vmem:[#allocation17_spill] sm:$0xff]  ;;  %v5043_v20 = vld [vmem:[#allocation68_spill] sm:$0xff] }
 0x212   : > { %1329 = vadd.xlane.f32.xlu1 %v4230_v7  ;;  %v4242_v3 = vmul.f32 %v3166_v57, %v857_v10  ;;  %v5013_v25 = vpack.c.bf16 %v4103_v28, %v4098_v60  ;;  %v1999_v57 = vpack.c.bf16 %v3896_v38, %v3894_v30  ;;  %v5014_v10 = vpack.c.bf16 %v4129_v0, %v4124_v46  ;;  %v5036_v30 = vld [vmem:[#allocation43_spill] sm:$0xff]  ;;  %v5038_v0 = vld [vmem:[#allocation53_spill] sm:$0xff] }
 0x213   : > { %1327 = vadd.xlane.f32.xlu0 %v4232_v6  ;;  %v3168_v37 = vpop.eup %3167  ;;  %v4478_v60 = vmul.f32 0.041666668, %v5038_v0  ;;  %v5047_v0 = vld [vmem:[#allocation74_spill] sm:$0xff] }
 0x214   : > { %v3170_v42 = vpop.eup %3169  ;;  %v4244_v26 = vmul.f32 %v3168_v37, %v856_v33  ;;  %v5015_v37 = vld [vmem:[#allocation15_spill] sm:$0xff]  ;;  %v4499_v23 = vmul.f32 0.041666668, %v5047_v0 }
 0x215   : > { %v3172_v16 = vpop.eup %3171  ;;  %v4248_v8 = vmul.f32 %v3170_v42, %v859_v13  ;;  %v2000_v33 = vpack.c.bf16 %v5015_v37, %v3898_v49  ;;  %v2001_v42 = vpack.c.bf16 %v5017_v14, %v5016_v29  ;;  %v5018_v13 = vld [vmem:[#allocation18_spill] sm:$0xff]  ;;  %v5034_v29 = vld [vmem:[#allocation33_spill] sm:$0xff]  ;;  %v4474_v37 = vmul.f32 0.041666668, %v5036_v30  ;;  %v5037_v49 = vld [vmem:[#allocation48_spill] sm:$0xff] }
 0x216   : > { %1333 = vadd.xlane.f32.xlu1 %v4236_v2  ;;  %v3174_v59 = vpop.eup %3173  ;;  %v4250_v55 = vmul.f32 %v3172_v16, %v858_v11  ;;  %v5019_v16 = vld [vmem:[#allocation19_spill] sm:$0xff]  ;;  %v1603_v28 = vmul.f32 0.041666668, %v5037_v49  ;;  %v4493_v30 = vmul.f32 0.041666668, %v5043_v20 }
 0x217   : > { %1331 = vadd.xlane.f32.xlu0 %v4238_v44  ;;  %v3176_v34 = vpop.eup %3175  ;;  %v4254_v40 = vmul.f32 %v3174_v59, %v861_v22  ;;  %v2002_v11 = vpack.c.bf16 %v5019_v16, %v5018_v13  ;;  %v5020_v59 = vld [vmem:[#allocation20_spill] sm:$0xff]  ;;  %v5021_v22 = vld [vmem:[#allocation21_spill] sm:$0xff]  ;;  %v1600_v16 = vmul.f32 0.041666668, %v5034_v29  ;;  %v5035_v13 = vld [vmem:[#allocation38_spill] sm:$0xff] }
 0x218   : > { %v3178_v50 = vpop.eup %3177  ;;  %v4256_v19 = vmul.f32 %v3176_v34, %v860_v36  ;;  %v2003_v34 = vpack.c.bf16 %v5021_v22, %v5020_v59  ;;  %v5022_v36 = vld [vmem:[#allocation22_spill] sm:$0xff]  ;;  %v5031_v59 = vld [vmem:[#allocation28_spill] sm:$0xff]  ;;  %v4471_v38 = vmul.f32 0.041666668, %v5035_v13  ;;  %v5042_v29 = vld [vmem:[#allocation67_spill] sm:$0xff] }
 0x219   : > { %v3180_v41 = vpop.eup %3179  ;;  %v4260_v24 = vmul.f32 %v3178_v50, %v863_v51  ;;  %v5023_v50 = vld [vmem:[#allocation23_spill] sm:$0xff]  ;;  %v4490_v13 = vmul.f32 0.041666668, %v5042_v29  ;;  %5044 = vst [vmem:[#allocation28_spill] sm:$0xff] %v4493_v30  ;;  %v4496_v49 = vmul.f32 0.041666668, %v5045_v17 }
 0x21a   : > { %1337 = vadd.xlane.f32.xlu1 %v4242_v3  ;;  %v3182_v32 = vpop.eup %3181  ;;  %v4262_v45 = vmul.f32 %v3180_v41, %v862_v18  ;;  %v2004_v51 = vpack.c.bf16 %v5023_v50, %v5022_v36  ;;  %v5024_v41 = vld [vmem:[#allocation24_spill] sm:$0xff]  ;;  %v5025_v18 = vld [vmem:[#allocation25_spill] sm:$0xff]  ;;  %v1597_v50 = vmul.f32 0.041666668, %v5031_v59  ;;  %v5033_v36 = vld [vmem:[#allocation31_spill] sm:$0xff] }
 0x21b   : > { %1335 = vadd.xlane.f32.xlu0 %v4244_v26  ;;  %v3184_v58 = vpop.eup %3183  ;;  %v4266_v15 = vmul.f32 %v3182_v32, %v865_v43  ;;  %v2005_v32 = vpack.c.bf16 %v5025_v18, %v5024_v41  ;;  %v5026_v43 = vld [vmem:[#allocation26_spill] sm:$0xff]  ;;  %v1599_v14 = vmul.f32 0.041666668, %v5033_v36  ;;  %v5040_v59 = vld [vmem:[#allocation61_spill] sm:$0xff]  ;;  %5048 = vst [vmem:[#allocation31_spill] sm:$0xff] %v4499_v23 }
 0x21c   : > { %v4268_v62 = vmul.f32 %v3184_v58, %v864_v54  ;;  %v5027_v58 = vld [vmem:[#allocation27_spill] sm:$0xff]  ;;  %v5041_v36 = vld [vmem:[#allocation62_spill] sm:$0xff] }
 0x21d   : > { %v2006_v54 = vpack.c.bf16 %v5027_v58, %v5026_v43  ;;  %v4487_v46 = vmul.f32 0.041666668, %v5041_v36 }
 0x21e   : > { %1341 = vadd.xlane.f32.xlu1 %v4248_v8 }
 0x21f   : > { %1339 = vadd.xlane.f32.xlu0 %v4250_v55 }
 0x222   : > { %1345 = vadd.xlane.f32.xlu1 %v4254_v40 }
 0x223   : > { %1343 = vadd.xlane.f32.xlu0 %v4256_v19 }
 0x226   : > { %1349 = vadd.xlane.f32.xlu1 %v4260_v24 }
 0x227   : > { %1347 = vadd.xlane.f32.xlu0 %v4262_v45 }
 0x22a   : > { %1353 = vadd.xlane.f32.xlu1 %v4266_v15 }
 0x22b   : > { %1351 = vadd.xlane.f32.xlu0 %v4268_v62 }
 0x23b   : > { %1759 = vrot.lane.b32.xlu1 %v5007_v4, %s3385_s21 }
 0x23f   : > { %1761 = vrot.lane.b32.xlu1 %v5008_v47, %s3385_s21 }
 0x241   : > { %1757 = vrot.lane.b32.xlu0 %v5009_v12, %s3385_s21 }
 0x243   : > { %1763 = vrot.lane.b32.xlu1 %v5010_v35, %s3385_s21 }
 0x245   : > { %1765 = vrot.lane.b32.xlu0 %v5011_v61, %s3385_s21 }
 0x247   : > { %1767 = vrot.lane.b32.xlu1 %v5012_v31, %s3385_s21 }
 0x249   : > { %1769 = vrot.lane.b32.xlu0 %v5013_v25, %s3385_s21 }
 0x24b   : > { %1771 = vrot.lane.b32.xlu1 %v5014_v10, %s3385_s21 }
 0x24d   : > { %2015 = vrot.lane.b32.xlu0 %v1999_v57, %s3385_s21 }
 0x24f   : > { %2017 = vrot.lane.b32.xlu1 %v2000_v33, %s3385_s21 }
 0x251   : > { %2019 = vrot.lane.b32.xlu0 %v2001_v42, %s3385_s21 }
 0x253   : > { %2021 = vrot.lane.b32.xlu1 %v2002_v11, %s3385_s21 }
 0x255   : > { %2023 = vrot.lane.b32.xlu0 %v2003_v34, %s3385_s21 }
 0x257   : > { %2025 = vrot.lane.b32.xlu1 %v2004_v51, %s3385_s21 }
 0x259   : > { %2027 = vrot.lane.b32.xlu0 %v2005_v32, %s3385_s21 }
 0x25b   : > { %2029 = vrot.lane.b32.xlu1 %v2006_v54, %s3385_s21 }
 0x29b   : > { %v1326_v4 = vpop.xlane.xlu1 %1325 }
 0x29c   : > { %3185 = vrcp.f32 %v1326_v4  ;;  %v1324_v47 = vpop.xlane.xlu0 %1323 }
 0x29d   : > { %3187 = vrcp.f32 %v1324_v47 }
 0x29f   : > { %v1330_v12 = vpop.xlane.xlu1 %1329 }
 0x2a0   : > { %3189 = vrcp.f32 %v1330_v12  ;;  %v1328_v35 = vpop.xlane.xlu0 %1327 }
 0x2a1   : > { %3191 = vrcp.f32 %v1328_v35 }
 0x2a3   : > { %v1334_v61 = vpop.xlane.xlu1 %1333 }
 0x2a4   : > { %3193 = vrcp.f32 %v1334_v61  ;;  %v1332_v31 = vpop.xlane.xlu0 %1331 }
 0x2a5   : > { %3195 = vrcp.f32 %v1332_v31 }
 0x2a6   : > { %v3186_v25 = vpop.eup %3185 }
 0x2a7   : > { %v3188_v57 = vpop.eup %3187  ;;  %v4329_v10 = vmul.f32 %v3186_v25, %v4218_v56  ;;  %v1338_v33 = vpop.xlane.xlu1 %1337 }
 0x2a8   : > { %v4332_v42 = vmul.f32 %v3188_v57, %v4220_v1  ;;  %3197 = vrcp.f32 %v1338_v33  ;;  %v1336_v11 = vpop.xlane.xlu0 %1335 }
 0x2a9   : > { %3199 = vrcp.f32 %v1336_v11  ;;  %v1614_v36 = vmul.f32 0.45833334, %v4329_v10 }
 0x2aa   : > { %v3190_v34 = vpop.eup %3189  ;;  %v4336_v51 = vpack.c.bf16 %v4329_v10, %v4332_v42  ;;  %v1613_v29 = vmul.f32 0.45833334, %v4332_v42 }
 0x2ab   : > { %v3192_v32 = vpop.eup %3191  ;;  %v4339_v54 = vmul.f32 %v3190_v34, %v4230_v7  ;;  %v1342_v4 = vpop.xlane.xlu1 %1341 }
 0x2ac   : > { %v4342_v56 = vmul.f32 %v3192_v32, %v4232_v6  ;;  %3201 = vrcp.f32 %v1342_v4  ;;  %2772 = vmatprep.subr.bf16.mxu0 %v4336_v51  ;;  %v1340_v1 = vpop.xlane.xlu0 %1339  ;;  %2788 = vmatprep.mubr.bf16.mxu0 %v4336_v51 }
 0x2ad   : > { %3203 = vrcp.f32 %v1340_v1  ;;  %2773 = vmatpush3.bf16.msra.mxu0 %v4336_v51  ;;  %v1616_v63 = vmul.f32 0.45833334, %v4339_v54 }
 0x2ae   : > { %v3194_v47 = vpop.eup %3193  ;;  %v4349_v12 = vpack.c.bf16 %v4339_v54, %v4342_v56 }
 0x2af   : > { %v3196_v7 = vpop.eup %3195  ;;  %v4352_v35 = vmul.f32 %v3194_v47, %v4236_v2  ;;  %v1346_v6 = vpop.xlane.xlu1 %1345  ;;  %v1632_v42 = vadd.f32 %v1616_v63, %v1600_v16 }
 0x2b0   : > { %v4355_v61 = vmul.f32 %v3196_v7, %v4238_v44  ;;  %3205 = vrcp.f32 %v1346_v6  ;;  %v1344_v31 = vpop.xlane.xlu0 %1343  ;;  %2774 = vmatprep.subr.bf16.mxu0 %v4349_v12 }
 0x2b1   : > { %3207 = vrcp.f32 %v1344_v31  ;;  %2775 = vmatpush3.bf16.msra.mxu0 %v4349_v12 }
 0x2b2   : > { %v3198_v25 = vpop.eup %3197  ;;  %v4361_v57 = vpack.c.bf16 %v4352_v35, %v4355_v61 }
 0x2b3   : > { %v3200_v33 = vpop.eup %3199  ;;  %v4364_v2 = vmul.f32 %v3198_v25, %v4242_v3  ;;  %v1350_v11 = vpop.xlane.xlu1 %1349 }
 0x2b4   : > { %v4367_v44 = vmul.f32 %v3200_v33, %v4244_v26  ;;  %3209 = vrcp.f32 %v1350_v11  ;;  %v1348_v34 = vpop.xlane.xlu0 %1347  ;;  %2776 = vmatprep.subr.bf16.mxu0 %v4361_v57 }
 0x2b5   : > { %3211 = vrcp.f32 %v1348_v34  ;;  %2777 = vmatpush3.bf16.msra.mxu0 %v4361_v57 }
 0x2b6   : > { %v3202_v32 = vpop.eup %3201  ;;  %v4373_v4 = vpack.c.bf16 %v4364_v2, %v4367_v44 }
 0x2b7   : > { %v3204_v1 = vpop.eup %3203  ;;  %v4376_v3 = vmul.f32 %v3202_v32, %v4248_v8  ;;  %v1354_v47 = vpop.xlane.xlu1 %1353 }
 0x2b8   : > { %v4379_v26 = vmul.f32 %v3204_v1, %v4250_v55  ;;  %3213 = vrcp.f32 %v1354_v47  ;;  %v1352_v7 = vpop.xlane.xlu0 %1351  ;;  %2778 = vmatprep.subr.bf16.mxu0 %v4373_v4 }
 0x2b9   : > { %3215 = vrcp.f32 %v1352_v7  ;;  %2779 = vmatpush3.bf16.msra.mxu0 %v4373_v4 }
 0x2ba   : > { %v3206_v6 = vpop.eup %3205  ;;  %v4385_v31 = vpack.c.bf16 %v4376_v3, %v4379_v26 }
 0x2bb   : > { %v3208_v25 = vpop.eup %3207  ;;  %v4388_v8 = vmul.f32 %v3206_v6, %v4254_v40  ;;  %v1760_v33 = vpop.permute.xlu1 %1759 }
 0x2bc   : > { %v4391_v55 = vmul.f32 %v3208_v25, %v4256_v19  ;;  %2780 = vmatprep.subr.bf16.mxu0 %v4385_v31  ;;  %v1758_v11 = vpop.permute.xlu0 %1757 }
 0x2bd   : > { %2781 = vmatpush3.bf16.msra.mxu0 %v4385_v31  ;;  %2836 = vmatprep.subr.bf16.mxu1 %v1758_v11 }
 0x2be   : > { %v3210_v34 = vpop.eup %3209  ;;  %2837 = vmatpush3.bf16.msra.mxu1 %v1758_v11  ;;  %v1392_v32 = vpack.c.bf16 %v4388_v8, %v4391_v55 }
 0x2bf   : > { %v3212_v1 = vpop.eup %3211  ;;  %v4398_v47 = vmul.f32 %v3210_v34, %v4260_v24  ;;  %2838 = vmatprep.subr.bf16.mxu1 %v1760_v33  ;;  %v1762_v19 = vpop.permute.xlu1 %1761 }
 0x2c0   : > { %v4401_v40 = vmul.f32 %v3212_v1, %v4262_v45  ;;  %2782 = vmatprep.subr.bf16.mxu0 %v1392_v32 }
 0x2c1   : > { %2783 = vmatpush3.bf16.msra.mxu0 %v1392_v32 }
 0x2c2   : > { %v3214_v7 = vpop.eup %3213  ;;  %2839 = vmatpush3.bf16.msra.mxu1 %v1760_v33  ;;  %v1393_v6 = vpack.c.bf16 %v4398_v47, %v4401_v40  ;;  %v1766_v33 = vpop.permute.xlu0 %1765 }
 0x2c3   : > { %v3216_v25 = vpop.eup %3215  ;;  %v4406_v11 = vmul.f32 %v3214_v7, %v4266_v15  ;;  %2840 = vmatprep.subr.bf16.mxu1 %v1762_v19  ;;  %v1764_v45 = vpop.permute.xlu1 %1763 }
 0x2c4   : > { %v4409_v24 = vmul.f32 %v3216_v25, %v4268_v62  ;;  %2784 = vmatprep.subr.bf16.mxu0 %v1393_v6 }
 0x2c5   : > { %2785 = vmatpush3.bf16.msra.mxu0 %v1393_v6 }
 0x2c6   : > { %2841 = vmatpush3.bf16.msra.mxu1 %v1762_v19  ;;  %v1394_v34 = vpack.c.bf16 %v4406_v11, %v4409_v24  ;;  %v1770_v62 = vpop.permute.xlu0 %1769 }
 0x2c7   : > { %2842 = vmatprep.subr.bf16.mxu1 %v1764_v45  ;;  %v1768_v15 = vpop.permute.xlu1 %1767 }
 0x2c8   : > { %2786 = vmatprep.subr.bf16.mxu0 %v1394_v34 }
 0x2c9   : > { %2787 = vmatpush3.bf16.msra.mxu0 %v1394_v34 }
 0x2ca   : > { %2804 = vmatprep.subr.bf16.mxu0 %v4336_v51  ;;  %2843 = vmatpush3.bf16.msra.mxu1 %v1764_v45 }
 0x2cb   : > { %2844 = vmatprep.subr.bf16.mxu1 %v1766_v33  ;;  %v1772_v1 = vpop.permute.xlu1 %1771 }
 0x2cc   : > { %2789 = vmatmul.mubr.bf16.vlgmr.msra.gmra.mrb[32].mxu0 %v4349_v12 }
 0x2cd   : > { %2792 = vmatprep.mubr.bf16.mxu0 %v4361_v57  ;;  %2805 = vmatpush3.bf16.msra.mxu0 %v4336_v51  ;;  %v4425_v51 = vpop.permute.xlu0 %2015 }
 0x2ce   : > { %2806 = vmatprep.subr.bf16.mxu0 %v4349_v12  ;;  %2845 = vmatpush3.bf16.msra.mxu1 %v1766_v33 }
 0x2cf   : > { %2846 = vmatprep.subr.bf16.mxu1 %v1768_v15 }
 0x2d1   : > { %2807 = vmatpush3.bf16.msra.mxu0 %v4349_v12 }
 0x2d2   : > { %2808 = vmatprep.subr.bf16.mxu0 %v4361_v57  ;;  %2847 = vmatpush3.bf16.msra.mxu1 %v1768_v15 }
 0x2d3   : > { %2848 = vmatprep.subr.bf16.mxu1 %v1770_v62 }
 0x2d4   : > { %2793 = vmatmul.mubr.bf16.gmra.mrb[36].mxu0 %v4373_v4 }
 0x2d5   : > { %2796 = vmatprep.mubr.bf16.mxu0 %v4385_v31  ;;  %2809 = vmatpush3.bf16.msra.mxu0 %v4361_v57 }
 0x2d6   : > { %2810 = vmatprep.subr.bf16.mxu0 %v4373_v4  ;;  %2849 = vmatpush3.bf16.msra.mxu1 %v1770_v62 }
 0x2d7   : > { %2850 = vmatprep.subr.bf16.mxu1 %v1772_v1 }
 0x2d9   : > { %2811 = vmatpush3.bf16.msra.mxu0 %v4373_v4 }
 0x2da   : > { %2812 = vmatprep.subr.bf16.mxu0 %v4385_v31  ;;  %2851 = vmatpush3.bf16.msra.mxu1 %v1772_v1 }
 0x2db   : > { %2900 = vmatprep.subr.bf16.mxu1 %v4425_v51 }
 0x2dc   : > { %2797 = vmatmul.mubr.bf16.gmra.mrb[40].mxu0 %v1392_v32 }
 0x2dd   : > { %2800 = vmatprep.mubr.bf16.mxu0 %v1393_v6  ;;  %2813 = vmatpush3.bf16.msra.mxu0 %v4385_v31 }
 0x2de   : > { %2814 = vmatprep.subr.bf16.mxu0 %v1392_v32 }
 0x2e1   : > { %2815 = vmatpush3.bf16.msra.mxu0 %v1392_v32 }
 0x2e2   : > { %2816 = vmatprep.subr.bf16.mxu0 %v1393_v6 }
 0x2e4   : > { %2801 = vmatmul.mubr.bf16.gmra.mrb[44].mxu0 %v1394_v34 }
 0x2e5   : > { %2817 = vmatpush3.bf16.msra.mxu0 %v1393_v6 }
 0x2e6   : > { %2818 = vmatprep.subr.bf16.mxu0 %v1394_v34 }
 0x2e9   : > { %2819 = vmatpush3.bf16.msra.mxu0 %v1394_v34 }
 0x39f   : > { %v2790_v12 = vpop.f32.mrb[32].mxu0 }
 0x3a0   : > { %v1429_v57 = vpop.f32.mrb[33].mxu0  ;;  %v1647_v20 = vmul.f32 0.45833334, %v2790_v12 }
 0x3a1   : > { %v2791_v4 = vpop.f32.mrb[34].mxu0  ;;  %v1645_v17 = vmul.f32 0.45833334, %v1429_v57 }
 0x3a2   : > { %v1493_v19 = vpack.c.bf16 %v2791_v4, %v2790_v12  ;;  %v1432_v7 = vpop.f32.mrb[35].mxu0  ;;  %v1648_v0 = vmul.f32 0.45833334, %v2791_v4  ;;  %v1619_v4 = vmul.f32 0.45833334, %v4367_v44 }
 0x3a3   : > { %v1492_v25 = vpack.c.bf16 %v1432_v7, %v1429_v57 }
 0x3a5   : > { %2820 = vmatprep.mubr.bf16.mxu0 %v1492_v25 }
 0x3a6   : > { %2821 = vmatmul.mubr.bf16.vlgmr.msra.gmra.mrb[48].mxu0 %v1493_v19 }
 0x3a7   : > { %v4430_v45 = vpop.f32.mrb[36].mxu0 }
 0x3a8   : > { %v4432_v33 = vpop.f32.mrb[37].mxu0 }
 0x3a9   : > { %v4434_v31 = vpop.f32.mrb[38].mxu0 }
 0x3aa   : > { %v1495_v32 = vpack.c.bf16 %v4434_v31, %v4430_v45  ;;  %v4438_v6 = vpop.f32.mrb[39].mxu0 }
 0x3ab   : > { %v1494_v34 = vpack.c.bf16 %v4438_v6, %v4432_v33 }
 0x3ad   : > { %2824 = vmatprep.mubr.bf16.mxu0 %v1494_v34 }
 0x3ae   : > { %2825 = vmatmul.mubr.bf16.gmra.mrb[52].mxu0 %v1495_v32 }
 0x3af   : > { %v4442_v15 = vpop.f32.mrb[40].mxu0 }
 0x3b0   : > { %v4444_v62 = vpop.f32.mrb[41].mxu0 }
 0x3b1   : > { %v4446_v1 = vpop.f32.mrb[42].mxu0 }
 0x3b2   : > { %v1497_v19 = vpack.c.bf16 %v4446_v1, %v4442_v15  ;;  %v4450_v25 = vpop.f32.mrb[43].mxu0 }
 0x3b3   : > { %v1496_v18 = vpack.c.bf16 %v4450_v25, %v4444_v62 }
 0x3b5   : > { %2828 = vmatprep.mubr.bf16.mxu0 %v1496_v18  ;;  %v5032_v18 = vld [vmem:[#allocation29_spill] sm:$0xff] }
 0x3b6   : > { %2829 = vmatmul.mubr.bf16.gmra.mrb[56].mxu0 %v1497_v19  ;;  %v1598_v19 = vmul.f32 0.041666668, %v5032_v18  ;;  %v4484_v18 = vmul.f32 0.041666668, %v5040_v59  ;;  %5046 = vst [vmem:[#allocation29_spill] sm:$0xff] %v4496_v49 }
 0x3b7   : > { %v4454_v41 = vpop.f32.mrb[44].mxu0  ;;  %v1615_v59 = vmul.f32 0.45833334, %v4342_v56  ;;  %v1629_v56 = vadd.f32 %v1613_v29, %v1597_v50  ;;  %v1620_v50 = vmul.f32 0.45833334, %v4364_v2 }
 0x3b8   : > { %v4456_v34 = vpop.f32.mrb[45].mxu0 }
 0x3b9   : > { %5028 = vst [vmem:[#allocation76_spill] sm:$0xff] %v4456_v34  ;;  %v4458_v32 = vpop.f32.mrb[46].mxu0  ;;  %v1631_v52 = vadd.f32 %v1615_v59, %v1599_v14 }
 0x3ba   : > { %5029 = vst [vmem:[#allocation77_spill] sm:$0xff] %v4458_v32  ;;  %v1499_v58 = vpack.c.bf16 %v4458_v32, %v4454_v41  ;;  %v4462_v43 = vpop.f32.mrb[47].mxu0 }
 0x3bb   : > { %5030 = vst [vmem:[#allocation78_spill] sm:$0xff] %v4462_v43  ;;  %v1498_v22 = vpack.c.bf16 %v4462_v43, %v4456_v34 }
 0x3bd   : > { %2832 = vmatprep.mubr.bf16.mxu0 %v1498_v22  ;;  %v5039_v22 = vld [vmem:[#allocation56_spill] sm:$0xff] }
 0x3be   : > { %2833 = vmatmul.mubr.bf16.gmra.mrb[60].mxu0 %v1499_v58  ;;  %v4481_v58 = vmul.f32 0.041666668, %v5039_v22  ;;  %v5049_v22 = vld [vmem:[#allocation75_spill] sm:$0xff] }
 0x3bf   : > { %v4502_v39 = vmul.f32 0.041666668, %v5049_v22 }
 0x3c1   : > { %5050 = vst [vmem:[#allocation33_spill] sm:$0xff] %v4502_v39  ;;  %v1646_v39 = vmul.f32 0.45833334, %v1432_v7 }
 0x479   : > { %v2822_v53 = vpop.f32.mrb[48].mxu0 }
 0x47a   : > { %v1663_v27 = vmul.f32 0.041666668, %v2822_v53  ;;  %v1534_v21 = vpop.f32.mrb[49].mxu0  ;;  %v1630_v53 = vadd.f32 %v1614_v36, %v1598_v19 }
 0x47b   : > { %v1661_v9 = vmul.f32 0.041666668, %v1534_v21  ;;  %v2823_v5 = vpop.f32.mrb[50].mxu0 }
 0x47c   : > { %v1679_v48 = vadd.f32 %v1663_v27, %v1647_v20  ;;  %v1664_v22 = vmul.f32 0.041666668, %v2823_v5  ;;  %v1537_v49 = vpop.f32.mrb[51].mxu0  ;;  %v1618_v27 = vmul.f32 0.45833334, %v4352_v35  ;;  %v1636_v20 = vadd.f32 %v1620_v50, %v4478_v60 }
 0x47d   : > { %v1677_v30 = vadd.f32 %v1661_v9, %v1645_v17  ;;  %v1662_v10 = vmul.f32 0.041666668, %v1537_v49  ;;  %v1617_v9 = vmul.f32 0.45833334, %v4355_v61  ;;  %v1635_v61 = vadd.f32 %v1619_v4, %v1603_v28 }
 0x47e   : > { %v1695_v43 = vadd.f32 %v1679_v48, %v1631_v52  ;;  %v1719_v23 = vsub.f32 %v1631_v52, %v1679_v48  ;;  %v1680_v32 = vadd.f32 %v1664_v22, %v1648_v0  ;;  %v1651_v52 = vmul.f32 0.45833334, %v4430_v45 }
 0x47f   : > { %v1693_v54 = vadd.f32 %v1677_v30, %v1629_v56  ;;  %v1717_v12 = vsub.f32 %v1629_v56, %v1677_v30  ;;  %v1678_v34 = vadd.f32 %v1662_v10, %v1646_v39  ;;  %v1634_v22 = vadd.f32 %v1618_v27, %v4474_v37 }
 0x480   : > { %v1696_v57 = vadd.f32 %v1680_v32, %v1632_v42  ;;  %v1720_v21 = vsub.f32 %v1632_v42, %v1680_v32  ;;  %v1649_v32 = vmul.f32 0.45833334, %v4432_v33  ;;  %v1623_v10 = vmul.f32 0.45833334, %v4391_v55 }
 0x481   : > { %v1694_v5 = vadd.f32 %v1678_v34, %v1630_v53  ;;  %v1718_v14 = vsub.f32 %v1630_v53, %v1678_v34  ;;  %v2826_v7 = vpop.f32.mrb[52].mxu0  ;;  %v1652_v34 = vmul.f32 0.45833334, %v4434_v31  ;;  %v2018_v31 = vpop.permute.xlu1 %2017  ;;  %v1622_v42 = vmul.f32 0.45833334, %v4376_v3 }
 0x482   : > { %v4513_v48 = vpack.c.bf16 %v1696_v57, %v1695_v43  ;;  %v4515_v63 = vpack.c.bf16 %v1720_v21, %v1719_v23  ;;  %v1667_v39 = vmul.f32 0.041666668, %v2826_v7  ;;  %v1550_v16 = vpop.f32.mrb[53].mxu0  ;;  %v1650_v43 = vmul.f32 0.45833334, %v4438_v6 }
 0x483   : > { %v1665_v44 = vmul.f32 0.041666668, %v1550_v16  ;;  %v2827_v19 = vpop.f32.mrb[54].mxu0  ;;  %v1709_v35 = vpack.c.bf16 %v1694_v5, %v1693_v54  ;;  %v4518_v30 = vpack.c.bf16 %v1718_v14, %v1717_v12  ;;  %v1633_v23 = vadd.f32 %v1617_v9, %v4471_v38  ;;  %v2020_v5 = vpop.permute.xlu0 %2019 }
 0x484   : > { %v1683_v49 = vadd.f32 %v1667_v39, %v1651_v52  ;;  %v1668_v2 = vmul.f32 0.041666668, %v2827_v19  ;;  %v1553_v59 = vpop.f32.mrb[55].mxu0  ;;  %v1621_v53 = vmul.f32 0.45833334, %v4379_v26 }
 0x485   : > { %v1681_v45 = vadd.f32 %v1665_v44, %v1649_v32  ;;  %v1666_v36 = vmul.f32 0.041666668, %v1553_v59  ;;  %2852 = vmatprep.mubr.bf16.mxu1 %v1709_v35  ;;  %2884 = vmatprep.mubr.bf16.mxu0 %v1709_v35  ;;  %v1624_v57 = vmul.f32 0.45833334, %v4388_v8  ;;  %v1655_v21 = vmul.f32 0.45833334, %v4442_v15 }
 0x486   : > { %v1699_v33 = vadd.f32 %v1683_v49, %v1635_v61  ;;  %v1723_v29 = vsub.f32 %v1635_v61, %v1683_v49  ;;  %v1684_v17 = vadd.f32 %v1668_v2, %v1652_v34  ;;  %2853 = vmatmul.mubr.bf16.vlgmr.msra.gmra.mrb[64].mxu1 %v4513_v48  ;;  %v1653_v55 = vmul.f32 0.45833334, %v4444_v62 }
 0x487   : > { %v1697_v28 = vadd.f32 %v1681_v45, %v1633_v23  ;;  %v1721_v0 = vsub.f32 %v1633_v23, %v1681_v45  ;;  %v1682_v56 = vadd.f32 %v1666_v36, %v1650_v43  ;;  %2901 = vmatpush3.bf16.msra.mxu1 %v4425_v51  ;;  %v1656_v26 = vmul.f32 0.45833334, %v4446_v1 }
 0x488   : > { %v1700_v38 = vadd.f32 %v1684_v17, %v1636_v20  ;;  %v1724_v6 = vsub.f32 %v1636_v20, %v1684_v17  ;;  %2902 = vmatprep.subr.bf16.mxu1 %v2018_v31  ;;  %v1639_v8 = vadd.f32 %v1623_v10, %v4487_v46  ;;  %v1654_v39 = vmul.f32 0.45833334, %v4450_v25  ;;  %v2022_v46 = vpop.permute.xlu1 %2021 }
 0x489   : > { %v1698_v54 = vadd.f32 %v1682_v56, %v1634_v22  ;;  %v1722_v60 = vsub.f32 %v1634_v22, %v1682_v56  ;;  %v2830_v12 = vpop.f32.mrb[56].mxu0  ;;  %v1637_v16 = vadd.f32 %v1621_v53, %v4481_v58  ;;  %v1640_v35 = vadd.f32 %v1624_v57, %v4490_v13  ;;  %v5055_v53 = vld [vmem:[#allocation28_spill] sm:$0xff] }
 0x48a   : > { %v1671_v37 = vmul.f32 0.041666668, %v2830_v12  ;;  %v1566_v4 = vpop.f32.mrb[57].mxu0  ;;  %v4532_v27 = vpack.c.bf16 %v1700_v38, %v1699_v33  ;;  %v4534_v51 = vpack.c.bf16 %v1724_v6, %v1723_v29  ;;  %v1638_v49 = vadd.f32 %v1622_v42, %v4484_v18 }
 0x48b   : > { %v1669_v14 = vmul.f32 0.041666668, %v1566_v4  ;;  %2903 = vmatpush3.bf16.msra.mxu1 %v2018_v31  ;;  %v2831_v3 = vpop.f32.mrb[58].mxu0  ;;  %v4537_v7 = vpack.c.bf16 %v1698_v54, %v1697_v28  ;;  %v4539_v9 = vpack.c.bf16 %v1722_v60, %v1721_v0  ;;  %v1627_v59 = vmul.f32 0.45833334, %v4409_v24  ;;  %v2024_v28 = vpop.permute.xlu0 %2023  ;;  %v5051_v0 = vld [vmem:[#allocation76_spill] sm:$0xff] }
 0x48c   : > { %v1687_v15 = vadd.f32 %v1671_v37, %v1655_v21  ;;  %v1672_v50 = vmul.f32 0.041666668, %v2831_v3  ;;  %2904 = vmatprep.subr.bf16.mxu1 %v2020_v5  ;;  %v1569_v52 = vpop.f32.mrb[59].mxu0  ;;  %v1626_v43 = vmul.f32 0.45833334, %v4398_v47  ;;  %v5054_v60 = vld [vmem:[#allocation78_spill] sm:$0xff] }
 0x48d   : > { %v1685_v62 = vadd.f32 %v1669_v14, %v1653_v55  ;;  %v1670_v32 = vmul.f32 0.041666668, %v1569_v52  ;;  %2856 = vmatprep.mubr.bf16.mxu1 %v4537_v7  ;;  %v1625_v36 = vmul.f32 0.45833334, %v4401_v40  ;;  %v1628_v33 = vmul.f32 0.45833334, %v4406_v11 }
 0x48e   : > { %v1703_v44 = vadd.f32 %v1687_v15, %v1639_v8  ;;  %v1727_v19 = vsub.f32 %v1639_v8, %v1687_v15  ;;  %v1688_v34 = vadd.f32 %v1672_v50, %v1656_v26  ;;  %2857 = vmatmul.mubr.bf16.gmra.mrb[68].mxu1 %v4532_v27  ;;  %v1659_v29 = vmul.f32 0.45833334, %v4454_v41  ;;  %v5052_v40 = vld [vmem:[#allocation77_spill] sm:$0xff]  ;;  %v5053_v11 = vld [vmem:[#allocation31_spill] sm:$0xff]  ;;  %v2026_v26 = vpop.permute.xlu1 %2025 }
 0x48f   : > { %v1701_v1 = vadd.f32 %v1685_v62, %v1637_v16  ;;  %v1725_v61 = vsub.f32 %v1637_v16, %v1685_v62  ;;  %v1686_v2 = vadd.f32 %v1670_v32, %v1654_v39  ;;  %2905 = vmatpush3.bf16.msra.mxu1 %v2020_v5  ;;  %v1657_v24 = vmul.f32 0.45833334, %v5051_v0  ;;  %v5056_v55 = vld [vmem:[#allocation33_spill] sm:$0xff]  ;;  %v5062_v0 = vld [vmem:[#allocation47_spill] sm:$0xff] }
 0x490   : > { %v1704_v25 = vadd.f32 %v1688_v34, %v1640_v35  ;;  %v1728_v58 = vsub.f32 %v1640_v35, %v1688_v34  ;;  %2906 = vmatprep.subr.bf16.mxu1 %v2022_v46  ;;  %v1660_v6 = vmul.f32 0.45833334, %v5052_v40  ;;  %v1643_v10 = vadd.f32 %v1627_v59, %v5053_v11  ;;  %v5057_v50 = vld [vmem:[#allocation29_spill] sm:$0xff]  ;;  %v2028_v34 = vpop.permute.xlu0 %2027  ;;  %v5059_v59 = vld [vmem:[#allocation32_spill] sm:$0xff] }
 0x491   : > { %v1702_v23 = vadd.f32 %v1686_v2, %v1638_v49  ;;  %v1726_v45 = vsub.f32 %v1638_v49, %v1686_v2  ;;  %v2834_v13 = vpop.f32.mrb[60].mxu0  ;;  %v1658_v12 = vmul.f32 0.45833334, %v5054_v60  ;;  %v1641_v57 = vadd.f32 %v1625_v36, %v5055_v53  ;;  %v5058_v2 = vld [vmem:[#allocation37_spill] sm:$0xff]  ;;  %v5066_v53 = vld [vmem:[#allocation58_spill] sm:$0xff] }
 0x492   : > { %v1675_v20 = vmul.f32 0.041666668, %v2834_v13  ;;  %v1582_v18 = vpop.f32.mrb[61].mxu0  ;;  %v4554_v17 = vpack.c.bf16 %v1704_v25, %v1703_v44  ;;  %v4556_v31 = vpack.c.bf16 %v1728_v58, %v1727_v19  ;;  %v1644_v14 = vadd.f32 %v1628_v33, %v5056_v55  ;;  %v5061_v33 = vld [vmem:[#allocation35_spill] sm:$0xff]  ;;  %v5068_v55 = vld [vmem:[#allocation60_spill] sm:$0xff] }
 0x493   : > { %v1673_v22 = vmul.f32 0.041666668, %v1582_v18  ;;  %2907 = vmatpush3.bf16.msra.mxu1 %v2022_v46  ;;  %v2835_v47 = vpop.f32.mrb[62].mxu0  ;;  %v4559_v56 = vpack.c.bf16 %v1702_v23, %v1701_v1  ;;  %v1737_v38 = vpack.c.bf16 %v1726_v45, %v1725_v61  ;;  %v1642_v52 = vadd.f32 %v1626_v43, %v5057_v50  ;;  %v2030_v61 = vpop.permute.xlu1 %2029  ;;  %v5060_v45 = vld [vmem:[#allocation40_spill] sm:$0xff] }
 0x494   : > { %v1691_v41 = vadd.f32 %v1675_v20, %v1659_v29  ;;  %v1676_v42 = vmul.f32 0.041666668, %v2835_v47  ;;  %2908 = vmatprep.subr.bf16.mxu1 %v2024_v28  ;;  %v1585_v54 = vpop.f32.mrb[63].mxu0  ;;  %v5063_v47 = vld [vmem:[#allocation42_spill] sm:$0xff] }
 0x495   : > { %v1689_v21 = vadd.f32 %v1673_v22, %v1657_v24  ;;  %v1674_v37 = vmul.f32 0.041666668, %v1585_v54  ;;  %2860 = vmatprep.mubr.bf16.mxu1 %v4559_v56 }
 0x496   : > { %v1707_v4 = vadd.f32 %v1691_v41, %v1643_v10  ;;  %v1731_v5 = vsub.f32 %v1643_v10, %v1691_v41  ;;  %v1692_v3 = vadd.f32 %v1676_v42, %v1660_v6  ;;  %2861 = vmatmul.mubr.bf16.gmra.mrb[72].mxu1 %v4554_v17  ;;  %v5064_v6 = vld [vmem:[#allocation50_spill] sm:$0xff]  ;;  %v5065_v41 = vld [vmem:[#allocation45_spill] sm:$0xff] }
 0x497   : > { %v1705_v8 = vadd.f32 %v1689_v21, %v1641_v57  ;;  %v1729_v15 = vsub.f32 %v1641_v57, %v1689_v21  ;;  %v1690_v39 = vadd.f32 %v1674_v37, %v1658_v12  ;;  %2909 = vmatpush3.bf16.msra.mxu1 %v2024_v28  ;;  %v5067_v37 = vld [vmem:[#allocation52_spill] sm:$0xff] }
 0x498   : > { %v1708_v16 = vadd.f32 %v1692_v3, %v1644_v14  ;;  %v1732_v62 = vsub.f32 %v1644_v14, %v1692_v3  ;;  %2910 = vmatprep.subr.bf16.mxu1 %v2026_v26 }
 0x499   : > { %v1706_v32 = vadd.f32 %v1690_v39, %v1642_v52  ;;  %v1730_v44 = vsub.f32 %v1642_v52, %v1690_v39  ;;  %v5070_v39 = vld [vmem:[#allocation70_spill] sm:$0xff] }
 0x49a   : > { %v4569_v19 = vpack.c.bf16 %v1708_v16, %v1707_v4  ;;  %v4571_v35 = vpack.c.bf16 %v1732_v62, %v1731_v5 }
 0x49b   : > { %2911 = vmatpush3.bf16.msra.mxu1 %v2026_v26  ;;  %v4573_v46 = vpack.c.bf16 %v1706_v32, %v1705_v8  ;;  %v4575_v1 = vpack.c.bf16 %v1730_v44, %v1729_v15  ;;  %v5069_v26 = vld [vmem:[#allocation55_spill] sm:$0xff]  ;;  %v5071_v32 = vld [vmem:[#allocation64_spill] sm:$0xff] }
 0x49c   : > { %2912 = vmatprep.subr.bf16.mxu1 %v2028_v34 }
 0x49d   : > { %2864 = vmatprep.mubr.bf16.mxu1 %v4573_v46 }
 0x49e   : > { %2865 = vmatmul.mubr.bf16.gmra.mrb[76].mxu1 %v4569_v19 }
 0x49f   : > { %2913 = vmatpush3.bf16.msra.mxu1 %v2028_v34  ;;  %2916 = vmatprep.mubr.bf16.mxu1 %v4518_v30 }
 0x4a0   : > { %2914 = vmatprep.subr.bf16.mxu1 %v2030_v61 }
 0x4a3   : > { %2915 = vmatpush3.bf16.msra.mxu1 %v2030_v61  ;;  %v5072_v61 = vld [vmem:[#allocation72_spill] sm:$0xff] }
 0x4a6   : > { %2917 = vmatmul.mubr.bf16.vlgmr.msra.gmra.mrb[80].mxu1 %v4515_v63 }
 0x4a7   : > { %2920 = vmatprep.mubr.bf16.mxu1 %v4539_v9 }
 0x4ae   : > { %2921 = vmatmul.mubr.bf16.gmra.mrb[84].mxu1 %v4534_v51 }
 0x4af   : > { %2924 = vmatprep.mubr.bf16.mxu1 %v1737_v38 }
 0x4b6   : > { %2925 = vmatmul.mubr.bf16.gmra.mrb[88].mxu1 %v4556_v31 }
 0x4b7   : > { %2928 = vmatprep.mubr.bf16.mxu1 %v4575_v1 }
 0x4be   : > { %2929 = vmatmul.mubr.bf16.gmra.mrb[92].mxu1 %v4571_v35 }
 0x4bf   : > { %2956 = vmatprep.mubr.bf16.mxu1 %v1737_v38 }
 0x559   : > { %v2854_v49 = vpop.f32.mrb[64].mxu1 }
 0x55a   : > { %v1880_v25 = vadd.f32 %v2854_v49, %v5058_v2  ;;  %v1815_v58 = vpop.f32.mrb[65].mxu1 }
 0x55b   : > { %v1878_v43 = vadd.f32 %v1815_v58, %v5059_v59  ;;  %v2855_v23 = vpop.f32.mrb[66].mxu1 }
 0x55c   : > { %v1881_v13 = vadd.f32 %v2855_v23, %v5060_v45  ;;  %v1818_v36 = vpop.f32.mrb[67].mxu1 }
 0x55d   : > { %v1879_v29 = vadd.f32 %v1818_v36, %v5061_v33  ;;  %v5074_v36 = vld [vmem:[#allocation14_spill] sm:$0xff] }
 0x55e   : > { %v1895_v20 = vpack.c.bf16 %v1881_v13, %v1880_v25  ;;  %v5073_v25 = vld [vmem:[#allocation66_spill] sm:$0xff] }
 0x55f   : > { %v1894_v18 = vpack.c.bf16 %v1879_v29, %v1878_v43  ;;  %v5075_v29 = vld [vmem:[#allocation15_spill] sm:$0xff] }
 0x561   : > { %v2858_v28 = vpop.f32.mrb[68].mxu1  ;;  %2868 = vmatprep.subr.bf16.mxu0 %v1894_v18 }
 0x562   : > { %v1884_v24 = vadd.f32 %v2858_v28, %v5062_v0  ;;  %v1831_v22 = vpop.f32.mrb[69].mxu1  ;;  %2869 = vmatpush3.bf16.msra.mxu0 %v1894_v18  ;;  %v5076_v28 = vld [vmem:[#allocation12_spill] sm:$0xff] }
 0x563   : > { %v1882_v38 = vadd.f32 %v1831_v22, %v5063_v47  ;;  %v2859_v40 = vpop.f32.mrb[70].mxu1  ;;  %2870 = vmatprep.subr.bf16.mxu0 %v1895_v20 }
 0x564   : > { %v1885_v11 = vadd.f32 %v2859_v40, %v5064_v6  ;;  %v1834_v10 = vpop.f32.mrb[71].mxu1 }
 0x565   : > { %v1883_v42 = vadd.f32 %v1834_v10, %v5065_v41  ;;  %v5078_v10 = vld [vmem:[#allocation18_spill] sm:$0xff] }
 0x566   : > { %v1897_v54 = vpack.c.bf16 %v1885_v11, %v1884_v24  ;;  %2871 = vmatpush3.bf16.msra.mxu0 %v1895_v20  ;;  %v5077_v24 = vld [vmem:[#allocation13_spill] sm:$0xff] }
 0x567   : > { %v1896_v60 = vpack.c.bf16 %v1883_v42, %v1882_v38  ;;  %v5079_v42 = vld [vmem:[#allocation19_spill] sm:$0xff] }
 0x569   : > { %v2862_v12 = vpop.f32.mrb[72].mxu1  ;;  %2872 = vmatprep.subr.bf16.mxu0 %v1896_v60 }
 0x56a   : > { %v1888_v57 = vadd.f32 %v2862_v12, %v5066_v53  ;;  %v1847_v21 = vpop.f32.mrb[73].mxu1  ;;  %2873 = vmatpush3.bf16.msra.mxu0 %v1896_v60  ;;  %v5080_v12 = vld [vmem:[#allocation16_spill] sm:$0xff] }
 0x56b   : > { %v1886_v4 = vadd.f32 %v1847_v21, %v5067_v37  ;;  %v2863_v5 = vpop.f32.mrb[74].mxu1  ;;  %2874 = vmatprep.subr.bf16.mxu0 %v1897_v54 }
 0x56c   : > { %v1889_v14 = vadd.f32 %v2863_v5, %v5068_v55  ;;  %v1850_v3 = vpop.f32.mrb[75].mxu1  ;;  %v5082_v55 = vld [vmem:[#allocation22_spill] sm:$0xff] }
 0x56d   : > { %v1887_v8 = vadd.f32 %v1850_v3, %v5069_v26  ;;  %v5083_v3 = vld [vmem:[#allocation23_spill] sm:$0xff] }
 0x56e   : > { %v1899_v15 = vpack.c.bf16 %v1889_v14, %v1888_v57  ;;  %2875 = vmatpush3.bf16.msra.mxu0 %v1897_v54  ;;  %v5081_v57 = vld [vmem:[#allocation17_spill] sm:$0xff] }
 0x56f   : > { %v1898_v50 = vpack.c.bf16 %v1887_v8, %v1886_v4 }
 0x571   : > { %v2866_v52 = vpop.f32.mrb[76].mxu1  ;;  %2876 = vmatprep.subr.bf16.mxu0 %v1898_v50 }
 0x572   : > { %v1892_v16 = vadd.f32 %v2866_v52, %v5070_v39  ;;  %v1863_v62 = vpop.f32.mrb[77].mxu1  ;;  %2877 = vmatpush3.bf16.msra.mxu0 %v1898_v50  ;;  %v5085_v52 = vld [vmem:[#allocation21_spill] sm:$0xff] }
 0x573   : > { %v1890_v44 = vadd.f32 %v1863_v62, %v5071_v32  ;;  %v2867_v34 = vpop.f32.mrb[78].mxu1  ;;  %2878 = vmatprep.subr.bf16.mxu0 %v1899_v15 }
 0x574   : > { %v1893_v49 = vadd.f32 %v2867_v34, %v5072_v61  ;;  %v1866_v2 = vpop.f32.mrb[79].mxu1  ;;  %v5087_v61 = vld [vmem:[#allocation27_spill] sm:$0xff] }
 0x575   : > { %v1891_v58 = vadd.f32 %v1866_v2, %v5073_v25  ;;  %v5088_v25 = vld [vmem:[#allocation24_spill] sm:$0xff] }
 0x576   : > { %v1901_v59 = vpack.c.bf16 %v1893_v49, %v1892_v16  ;;  %2879 = vmatpush3.bf16.msra.mxu0 %v1899_v15  ;;  %v5084_v15 = vld [vmem:[#allocation20_spill] sm:$0xff] }
 0x577   : > { %v1900_v43 = vpack.c.bf16 %v1891_v58, %v1890_v44  ;;  %v5086_v44 = vld [vmem:[#allocation26_spill] sm:$0xff] }
 0x579   : > { %2880 = vmatprep.subr.bf16.mxu0 %v1900_v43  ;;  %v2918_v23 = vpop.f32.mrb[80].mxu1 }
 0x57a   : > { %2881 = vmatpush3.bf16.msra.mxu0 %v1900_v43  ;;  %v2073_v45 = vpop.f32.mrb[81].mxu1  ;;  %v2138_v33 = vadd.f32 %v2918_v23, %v5074_v36 }
 0x57b   : > { %2882 = vmatprep.subr.bf16.mxu0 %v1901_v59  ;;  %v2919_v13 = vpop.f32.mrb[82].mxu1  ;;  %v2136_v0 = vadd.f32 %v5076_v28, %v2073_v45 }
 0x57c   : > { %v2139_v20 = vadd.f32 %v2919_v13, %v5075_v29  ;;  %v2076_v18 = vpop.f32.mrb[83].mxu1  ;;  %v5093_v13 = vld [vmem:[#allocation34_spill] sm:$0xff] }
 0x57d   : > { %v2137_v22 = vadd.f32 %v5077_v24, %v2076_v18 }
 0x57e   : > { %v2153_v47 = vpack.c.bf16 %v2139_v20, %v2138_v33  ;;  %2883 = vmatpush3.bf16.msra.mxu0 %v1901_v59  ;;  %v5089_v59 = vld [vmem:[#allocation25_spill] sm:$0xff] }
 0x57f   : > { %v2152_v38 = vpack.c.bf16 %v2137_v22, %v2136_v0 }
 0x581   : > { %2885 = vmatmul.mubr.bf16.vlgmr.msra.gmra.mrb[64].mxu0 %v4513_v48  ;;  %v2922_v40 = vpop.f32.mrb[84].mxu1  ;;  %2932 = vmatprep.subr.bf16.mxu0 %v2152_v38 }
 0x582   : > { %2996 = vmatprep.subr.bf16.mxu1 %v2152_v38  ;;  %2888 = vmatprep.mubr.bf16.mxu0 %v4537_v7  ;;  %v2089_v6 = vpop.f32.mrb[85].mxu1  ;;  %v2142_v41 = vadd.f32 %v2922_v40, %v5078_v10 }
 0x583   : > { %2933 = vmatpush3.bf16.msra.mxu0 %v2152_v38  ;;  %3004 = vmatpush3.bf16.msra.mxu1 %v2152_v38  ;;  %v2923_v11 = vpop.f32.mrb[86].mxu1  ;;  %v2140_v53 = vadd.f32 %v5080_v12, %v2089_v6  ;;  %v5094_v38 = vld [vmem:[#allocation46_spill] sm:$0xff]  ;;  %v5095_v6 = vld [vmem:[#allocation41_spill] sm:$0xff]  ;;  %v5097_v12 = vld [vmem:[#allocation44_spill] sm:$0xff] }
 0x584   : > { %v2143_v54 = vadd.f32 %v2923_v11, %v5079_v42  ;;  %2934 = vmatprep.subr.bf16.mxu0 %v2153_v47  ;;  %2997 = vmatprep.subr.bf16.mxu1 %v2153_v47  ;;  %v2092_v60 = vpop.f32.mrb[87].mxu1 }
 0x585   : > { %v2141_v48 = vadd.f32 %v5081_v57, %v2092_v60 }
 0x586   : > { %v2155_v21 = vpack.c.bf16 %v2143_v54, %v2142_v41  ;;  %v5096_v41 = vld [vmem:[#allocation49_spill] sm:$0xff] }
 0x587   : > { %v2154_v37 = vpack.c.bf16 %v2141_v48, %v2140_v53  ;;  %2935 = vmatpush3.bf16.msra.mxu0 %v2153_v47  ;;  %3005 = vmatpush3.bf16.msra.mxu1 %v2153_v47 }
 0x589   : > { %2889 = vmatmul.mubr.bf16.gmra.mrb[68].mxu0 %v4532_v27  ;;  %v2926_v7 = vpop.f32.mrb[88].mxu1  ;;  %2936 = vmatprep.subr.bf16.mxu0 %v2154_v37 }
 0x58a   : > { %2998 = vmatprep.subr.bf16.mxu1 %v2154_v37  ;;  %2892 = vmatprep.mubr.bf16.mxu0 %v4559_v56  ;;  %v2105_v4 = vpop.f32.mrb[89].mxu1  ;;  %v2146_v14 = vadd.f32 %v2926_v7, %v5082_v55 }
 0x58b   : > { %2937 = vmatpush3.bf16.msra.mxu0 %v2154_v37  ;;  %3006 = vmatpush3.bf16.msra.mxu1 %v2154_v37  ;;  %v2927_v5 = vpop.f32.mrb[90].mxu1  ;;  %v2144_v50 = vadd.f32 %v5084_v15, %v2105_v4 }
 0x58c   : > { %v2147_v26 = vadd.f32 %v2927_v5, %v5083_v3  ;;  %2938 = vmatprep.subr.bf16.mxu0 %v2155_v21  ;;  %2999 = vmatprep.subr.bf16.mxu1 %v2155_v21  ;;  %v2108_v8 = vpop.f32.mrb[91].mxu1  ;;  %v5098_v3 = vld [vmem:[#allocation57_spill] sm:$0xff] }
 0x58d   : > { %v2145_v27 = vadd.f32 %v5085_v52, %v2108_v8  ;;  %v5099_v8 = vld [vmem:[#allocation51_spill] sm:$0xff] }
 0x58e   : > { %v2157_v39 = vpack.c.bf16 %v2147_v26, %v2146_v14  ;;  %v5100_v52 = vld [vmem:[#allocation59_spill] sm:$0xff] }
 0x58f   : > { %v2156_v16 = vpack.c.bf16 %v2145_v27, %v2144_v50  ;;  %2939 = vmatpush3.bf16.msra.mxu0 %v2155_v21  ;;  %3007 = vmatpush3.bf16.msra.mxu1 %v2155_v21 }
 0x591   : > { %2893 = vmatmul.mubr.bf16.gmra.mrb[72].mxu0 %v4554_v17  ;;  %v2930_v56 = vpop.f32.mrb[92].mxu1  ;;  %2940 = vmatprep.subr.bf16.mxu0 %v2156_v16 }
 0x592   : > { %3000 = vmatprep.subr.bf16.mxu1 %v2156_v16  ;;  %2896 = vmatprep.mubr.bf16.mxu0 %v4573_v46  ;;  %v2121_v62 = vpop.f32.mrb[93].mxu1  ;;  %v2150_v34 = vadd.f32 %v2930_v56, %v5086_v44  ;;  %v5101_v56 = vld [vmem:[#allocation54_spill] sm:$0xff] }
 0x593   : > { %2941 = vmatpush3.bf16.msra.mxu0 %v2156_v16  ;;  %3008 = vmatpush3.bf16.msra.mxu1 %v2156_v16  ;;  %v2931_v32 = vpop.f32.mrb[94].mxu1  ;;  %v2148_v58 = vadd.f32 %v5088_v25, %v2121_v62 }
 0x594   : > { %v2151_v49 = vadd.f32 %v2931_v32, %v5087_v61  ;;  %2942 = vmatprep.subr.bf16.mxu0 %v2157_v39  ;;  %3001 = vmatprep.subr.bf16.mxu1 %v2157_v39  ;;  %v2124_v2 = vpop.f32.mrb[95].mxu1 }
 0x595   : > { %v2149_v17 = vadd.f32 %v5089_v59, %v2124_v2 }
 0x596   : > { %v2159_v43 = vpack.c.bf16 %v2151_v49, %v2150_v34 }
 0x597   : > { %v2158_v23 = vpack.c.bf16 %v2149_v17, %v2148_v58  ;;  %2943 = vmatpush3.bf16.msra.mxu0 %v2157_v39  ;;  %3009 = vmatpush3.bf16.msra.mxu1 %v2157_v39  ;;  %v5102_v17 = vld [vmem:[#allocation69_spill] sm:$0xff] }
 0x599   : > { %2897 = vmatmul.mubr.bf16.gmra.mrb[76].mxu0 %v4569_v19  ;;  %2944 = vmatprep.subr.bf16.mxu0 %v2158_v23  ;;  %v5090_v19 = vld [vmem:[#allocation36_spill] sm:$0xff] }
 0x59a   : > { %3002 = vmatprep.subr.bf16.mxu1 %v2158_v23  ;;  %2948 = vmatprep.mubr.bf16.mxu0 %v4518_v30  ;;  %v4635_v30 = vld [vmem:[%s4869_s2] ss:$0 sm:$0xff] }
 0x59b   : > { %2945 = vmatpush3.bf16.msra.mxu0 %v2158_v23  ;;  %3010 = vmatpush3.bf16.msra.mxu1 %v2158_v23  ;;  %v4639_v46 = vadd.f32 %v4635_v30, %v5090_v19  ;;  %v4653_v36 = vadd.f32 %v4635_v30, %v5093_v13  ;;  %v4666_v40 = vadd.f32 %v4635_v30, %v5094_v38  ;;  %v5103_v23 = vld [vmem:[#allocation63_spill] sm:$0xff]  ;;  %v5105_v13 = vld [vmem:[#allocation65_spill] sm:$0xff] }
 0x59c   : > { %2946 = vmatprep.subr.bf16.mxu0 %v2159_v43  ;;  %3003 = vmatprep.subr.bf16.mxu1 %v2159_v43  ;;  %v4672_v11 = vadd.f32 %v4635_v30, %v5095_v6  ;;  %v4678_v42 = vadd.f32 %v4635_v30, %v5096_v41  ;;  %v4683_v53 = vadd.f32 %v4635_v30, %v5097_v12 }
 0x59d   : > { %v4694_v26 = vadd.f32 %v4635_v30, %v5098_v3  ;;  %v4700_v15 = vadd.f32 %v4635_v30, %v5099_v8  ;;  %v4706_v27 = vadd.f32 %v4635_v30, %v5100_v52  ;;  %v4711_v62 = vadd.f32 %v4635_v30, %v5101_v56 }
 0x59e   : > { %v4728_v19 = vadd.f32 %v4635_v30, %v5103_v23 }
 0x59f   : > { %2947 = vmatpush3.bf16.msra.mxu0 %v2159_v43  ;;  %3011 = vmatpush3.bf16.msra.mxu1 %v2159_v43  ;;  %v4722_v43 = vadd.f32 %v4635_v30, %v5102_v17 }
 0x5a2   : > { %2949 = vmatmul.mubr.bf16.vlgmr.msra.gmra.mrb[80].mxu0 %v4515_v63  ;;  %2957 = vmatmul.mubr.bf16.vlgmr.msra.gmra.mrb[96].mxu1 %v4556_v31  ;;  %v5091_v63 = vld [vmem:[#allocation30_spill] sm:$0xff] }
 0x5a3   : > { %2952 = vmatprep.mubr.bf16.mxu0 %v4539_v9  ;;  %2960 = vmatprep.mubr.bf16.mxu1 %v4575_v1  ;;  %v4644_v31 = vadd.f32 %v4635_v30, %v5091_v63  ;;  %v5092_v1 = vld [vmem:[#allocation39_spill] sm:$0xff] }
 0x5aa   : > { %2953 = vmatmul.mubr.bf16.gmra.mrb[84].mxu0 %v4534_v51  ;;  %2961 = vmatmul.mubr.bf16.gmra.mrb[100].mxu1 %v4571_v35  ;;  %v4648_v51 = vadd.f32 %v4635_v30, %v5092_v1 }
 0x654   : > { %v2886_v9 = vpop.f32.mrb[64].mxu0 }
 0x655   : > { %v2259_v35 = vadd.f32 %v2886_v9, %v4639_v46  ;;  %v1936_v45 = vpop.f32.mrb[65].mxu0  ;;  %v5104_v9 = vld [vmem:[#allocation71_spill] sm:$0xff] }
 0x656   : > { %v2257_v33 = vadd.f32 %v1936_v45, %v4644_v31  ;;  %v2887_v29 = vpop.f32.mrb[66].mxu0  ;;  %v4734_v1 = vadd.f32 %v4635_v30, %v5104_v9 }
 0x657   : > { %v2275_v20 = vmax.f32 %v2259_v35, 0.0  ;;  %v2260_v18 = vadd.f32 %v2887_v29, %v4648_v51  ;;  %v1939_v28 = vpop.f32.mrb[67].mxu0 }
 0x658   : > { %v2273_v0 = vmax.f32 %v2257_v33, 0.0  ;;  %v2258_v24 = vadd.f32 %v1939_v28, %v4653_v36  ;;  %v4739_v33 = vadd.f32 %v4635_v30, %v5105_v13 }
 0x659   : > { %2292 = vst.msk [vmem:[%s4658_s25 + $0x10] sm:$0xff] %vm2289_vm0, %v2275_v20  ;;  %v2276_v22 = vmax.f32 %v2260_v18, 0.0 }
 0x65a   : > { %2290 = vst.msk [vmem:[%s4658_s25] sm:$0xff] %vm2289_vm0, %v2273_v0  ;;  %v2274_v47 = vmax.f32 %v2258_v24, 0.0 }
 0x65b   : > { %2293 = vst.msk [vmem:[%s4658_s25 + $0x18] sm:$0xff] %vm2289_vm0, %v2276_v22 }
 0x65c   : > { %2291 = vst.msk [vmem:[%s4658_s25 + $0x8] sm:$0xff] %vm2289_vm0, %v2274_v47  ;;  %v2890_v10 = vpop.f32.mrb[68].mxu0 }
 0x65d   : > { %v2263_v54 = vadd.f32 %v2890_v10, %v4666_v40  ;;  %v1952_v60 = vpop.f32.mrb[69].mxu0 }
 0x65e   : > { %v2261_v57 = vadd.f32 %v1952_v60, %v4672_v11  ;;  %v2891_v48 = vpop.f32.mrb[70].mxu0 }
 0x65f   : > { %v2279_v21 = vmax.f32 %v2263_v54, 0.0  ;;  %v2264_v37 = vadd.f32 %v2891_v48, %v4678_v42  ;;  %v1955_v7 = vpop.f32.mrb[71].mxu0 }
 0x660   : > { %v2277_v4 = vmax.f32 %v2261_v57, 0.0  ;;  %v2262_v5 = vadd.f32 %v1955_v7, %v4683_v53 }
 0x661   : > { %2296 = vst.msk [vmem:[%s4658_s25 + $0x30] sm:$0xff] %vm2289_vm0, %v2279_v21  ;;  %v2280_v55 = vmax.f32 %v2264_v37, 0.0 }
 0x662   : > { %2294 = vst.msk [vmem:[%s4658_s25 + $0x20] sm:$0xff] %vm2289_vm0, %v2277_v4  ;;  %v2278_v14 = vmax.f32 %v2262_v5, 0.0 }
 0x663   : > { %2297 = vst.msk [vmem:[%s4658_s25 + $0x38] sm:$0xff] %vm2289_vm0, %v2280_v55 }
 0x664   : > { %2295 = vst.msk [vmem:[%s4658_s25 + $0x28] sm:$0xff] %vm2289_vm0, %v2278_v14  ;;  %v2894_v50 = vpop.f32.mrb[72].mxu0 }
 0x665   : > { %v2267_v39 = vadd.f32 %v2894_v50, %v4694_v26  ;;  %v1968_v16 = vpop.f32.mrb[73].mxu0 }
 0x666   : > { %v2265_v32 = vadd.f32 %v1968_v16, %v4700_v15  ;;  %v2895_v44 = vpop.f32.mrb[74].mxu0 }
 0x667   : > { %v2283_v34 = vmax.f32 %v2267_v39, 0.0  ;;  %v2268_v61 = vadd.f32 %v2895_v44, %v4706_v27  ;;  %v1971_v49 = vpop.f32.mrb[75].mxu0 }
 0x668   : > { %v2281_v2 = vmax.f32 %v2265_v32, 0.0  ;;  %v2266_v25 = vadd.f32 %v1971_v49, %v4711_v62 }
 0x669   : > { %2300 = vst.msk [vmem:[%s4658_s25 + $0x50] sm:$0xff] %vm2289_vm0, %v2283_v34  ;;  %v2284_v58 = vmax.f32 %v2268_v61, 0.0 }
 0x66a   : > { %2298 = vst.msk [vmem:[%s4658_s25 + $0x40] sm:$0xff] %vm2289_vm0, %v2281_v2  ;;  %v2282_v59 = vmax.f32 %v2266_v25, 0.0 }
 0x66b   : > { %2301 = vst.msk [vmem:[%s4658_s25 + $0x58] sm:$0xff] %vm2289_vm0, %v2284_v58 }
 0x66c   : > { %2299 = vst.msk [vmem:[%s4658_s25 + $0x48] sm:$0xff] %vm2289_vm0, %v2282_v59  ;;  %v2898_v63 = vpop.f32.mrb[76].mxu0 }
 0x66d   : > { %v2271_v35 = vadd.f32 %v2898_v63, %v4722_v43  ;;  %v1984_v45 = vpop.f32.mrb[77].mxu0 }
 0x66e   : > { %v2269_v29 = vadd.f32 %v1984_v45, %v4728_v19  ;;  %v2899_v20 = vpop.f32.mrb[78].mxu0 }
 0x66f   : > { %v2287_v18 = vmax.f32 %v2271_v35, 0.0  ;;  %v2272_v28 = vadd.f32 %v2899_v20, %v4734_v1  ;;  %v1987_v0 = vpop.f32.mrb[79].mxu0 }
 0x670   : > { %v2285_v24 = vmax.f32 %v2269_v29, 0.0  ;;  %v2270_v22 = vadd.f32 %v1987_v0, %v4739_v33 }
 0x671   : > { %2304 = vst.msk [vmem:[%s4658_s25 + $0x70] sm:$0xff] %vm2289_vm0, %v2287_v18  ;;  %v2288_v47 = vmax.f32 %v2272_v28, 0.0 }
 0x672   : > { %2302 = vst.msk [vmem:[%s4658_s25 + $0x60] sm:$0xff] %vm2289_vm0, %v2285_v24  ;;  %v2286_v38 = vmax.f32 %v2270_v22, 0.0 }
 0x673   : > { %2305 = vst.msk [vmem:[%s4658_s25 + $0x78] sm:$0xff] %vm2289_vm0, %v2288_v47 }
 0x674   : > { %2303 = vst.msk [vmem:[%s4658_s25 + $0x68] sm:$0xff] %vm2289_vm0, %v2286_v38 }
 0x675   : > { %v2950_v30 = vpop.f32.mrb[80].mxu0  ;;  %v2958_v6 = vpop.f32.mrb[96].mxu1 }
 0x676   : > { %v2226_v10 = vpop.f32.mrb[97].mxu1  ;;  %2326 = vrot.lane.b32.xlu0 %v2950_v30, %s3385_s21  ;;  %v2194_v41 = vpop.f32.mrb[81].mxu0 }
 0x677   : > { %v2951_v54 = vpop.f32.mrb[82].mxu0  ;;  %v2959_v60 = vpop.f32.mrb[98].mxu1 }
 0x678   : > { %v2229_v12 = vpop.f32.mrb[99].mxu1  ;;  %2328 = vrot.lane.b32.xlu1 %v2951_v54, %s3385_s21  ;;  %v2197_v57 = vpop.f32.mrb[83].mxu0 }
 0x67a   : > { %2342 = vrot.lane.b32.xlu0 %v2958_v6, %s3385_s21 }
 0x67c   : > { %2344 = vrot.lane.b32.xlu1 %v2959_v60, %s3385_s21 }
 0x67d   : > { %v2954_v48 = vpop.f32.mrb[84].mxu0  ;;  %v2962_v21 = vpop.f32.mrb[100].mxu1 }
 0x67e   : > { %v2242_v37 = vpop.f32.mrb[101].mxu1  ;;  %2322 = vrot.lane.b32.xlu0 %v2194_v41, %s3385_s21  ;;  %v2210_v7 = vpop.f32.mrb[85].mxu0 }
 0x67f   : > { %v2955_v4 = vpop.f32.mrb[86].mxu0  ;;  %v2963_v5 = vpop.f32.mrb[102].mxu1 }
 0x680   : > { %v2245_v55 = vpop.f32.mrb[103].mxu1  ;;  %2324 = vrot.lane.b32.xlu1 %v2197_v57, %s3385_s21  ;;  %v2213_v14 = vpop.f32.mrb[87].mxu0 }
 0x682   : > { %2338 = vrot.lane.b32.xlu0 %v2226_v10, %s3385_s21 }
 0x684   : > { %2340 = vrot.lane.b32.xlu1 %v2229_v12, %s3385_s21 }
 0x686   : > { %2334 = vrot.lane.b32.xlu0 %v2954_v48, %s3385_s21 }
 0x688   : > { %2336 = vrot.lane.b32.xlu1 %v2955_v4, %s3385_s21 }
 0x68a   : > { %2330 = vrot.lane.b32.xlu0 %v2210_v7, %s3385_s21 }
 0x68c   : > { %2332 = vrot.lane.b32.xlu1 %v2213_v14, %s3385_s21 }
 0x68e   : > { %2346 = vrot.lane.b32.xlu0 %v2242_v37, %s3385_s21 }
 0x690   : > { %2348 = vrot.lane.b32.xlu1 %v2245_v55, %s3385_s21 }
 0x692   : > { %2350 = vrot.lane.b32.xlu0 %v2962_v21, %s3385_s21 }
 0x694   : > { %2352 = vrot.lane.b32.xlu1 %v2963_v5, %s3385_s21 }
 0x6e8   : > { %v2327_v3 = vpop.permute.xlu0 %2326 }
 0x6e9   : > { %v2372_v8 = vadd.f32 %v2327_v3, %v4639_v46 }
 0x6ea   : > { %v2329_v50 = vpop.permute.xlu1 %2328 }
 0x6eb   : > { %v2388_v52 = vmax.f32 %v2372_v8, 0.0  ;;  %v2373_v39 = vadd.f32 %v2329_v50, %v4648_v51 }
 0x6ec   : > { %v2343_v16 = vpop.permute.xlu0 %2342 }
 0x6ed   : > { %2405 = vst.msk [vmem:[%s4658_s25 + $0x10] sm:$0xff] %vm2402_vm1, %v2388_v52  ;;  %v2389_v56 = vmax.f32 %v2373_v39, 0.0  ;;  %v2380_v32 = vadd.f32 %v2343_v16, %v4694_v26 }
 0x6ee   : > { %v2345_v44 = vpop.permute.xlu1 %2344 }
 0x6ef   : > { %2406 = vst.msk [vmem:[%s4658_s25 + $0x18] sm:$0xff] %vm2402_vm1, %v2389_v56  ;;  %v2396_v34 = vmax.f32 %v2380_v32, 0.0  ;;  %v2381_v46 = vadd.f32 %v2345_v44, %v4706_v27 }
 0x6f0   : > { %v2323_v61 = vpop.permute.xlu0 %2322 }
 0x6f1   : > { %2413 = vst.msk [vmem:[%s4658_s25 + $0x50] sm:$0xff] %vm2402_vm1, %v2396_v34  ;;  %v2397_v49 = vmax.f32 %v2381_v46, 0.0  ;;  %v2370_v51 = vadd.f32 %v2323_v61, %v4644_v31 }
 0x6f2   : > { %v2325_v2 = vpop.permute.xlu1 %2324 }
 0x6f3   : > { %2414 = vst.msk [vmem:[%s4658_s25 + $0x58] sm:$0xff] %vm2402_vm1, %v2397_v49  ;;  %v2386_v25 = vmax.f32 %v2370_v51, 0.0  ;;  %v2371_v26 = vadd.f32 %v2325_v2, %v4653_v36 }
 0x6f4   : > { %v2339_v58 = vpop.permute.xlu0 %2338 }
 0x6f5   : > { %2403 = vst.msk [vmem:[%s4658_s25] sm:$0xff] %vm2402_vm1, %v2386_v25  ;;  %v2387_v59 = vmax.f32 %v2371_v26, 0.0  ;;  %v2378_v27 = vadd.f32 %v2339_v58, %v4700_v15 }
 0x6f6   : > { %v2341_v17 = vpop.permute.xlu1 %2340 }
 0x6f7   : > { %2404 = vst.msk [vmem:[%s4658_s25 + $0x8] sm:$0xff] %vm2402_vm1, %v2387_v59  ;;  %v2394_v23 = vmax.f32 %v2378_v27, 0.0  ;;  %v2379_v31 = vadd.f32 %v2341_v17, %v4711_v62 }
 0x6f8   : > { %v2335_v63 = vpop.permute.xlu0 %2334 }
 0x6f9   : > { %2411 = vst.msk [vmem:[%s4658_s25 + $0x40] sm:$0xff] %vm2402_vm1, %v2394_v23  ;;  %v2395_v9 = vmax.f32 %v2379_v31, 0.0  ;;  %v2376_v36 = vadd.f32 %v2335_v63, %v4666_v40 }
 0x6fa   : > { %v2337_v35 = vpop.permute.xlu1 %2336 }
 0x6fb   : > { %2412 = vst.msk [vmem:[%s4658_s25 + $0x48] sm:$0xff] %vm2402_vm1, %v2395_v9  ;;  %v2392_v45 = vmax.f32 %v2376_v36, 0.0  ;;  %v2377_v15 = vadd.f32 %v2337_v35, %v4678_v42 }
 0x6fc   : > { %v2331_v13 = vpop.permute.xlu0 %2330 }
 0x6fd   : > { %2409 = vst.msk [vmem:[%s4658_s25 + $0x30] sm:$0xff] %vm2402_vm1, %v2392_v45  ;;  %v2393_v29 = vmax.f32 %v2377_v15, 0.0  ;;  %v2374_v62 = vadd.f32 %v2331_v13, %v4672_v11 }
 0x6fe   : > { %v2333_v20 = vpop.permute.xlu1 %2332 }
 0x6ff   : > { %2410 = vst.msk [vmem:[%s4658_s25 + $0x38] sm:$0xff] %vm2402_vm1, %v2393_v29  ;;  %v2390_v40 = vmax.f32 %v2374_v62, 0.0  ;;  %v2375_v18 = vadd.f32 %v2333_v20, %v4683_v53 }
 0x700   : > { %v2347_v28 = vpop.permute.xlu0 %2346 }
 0x701   : > { %2407 = vst.msk [vmem:[%s4658_s25 + $0x20] sm:$0xff] %vm2402_vm1, %v2390_v40  ;;  %v2391_v42 = vmax.f32 %v2375_v18, 0.0  ;;  %v2382_v0 = vadd.f32 %v2347_v28, %v4728_v19 }
 0x702   : > { %v2349_v24 = vpop.permute.xlu1 %2348 }
 0x703   : > { %2408 = vst.msk [vmem:[%s4658_s25 + $0x28] sm:$0xff] %vm2402_vm1, %v2391_v42  ;;  %v2398_v11 = vmax.f32 %v2382_v0, 0.0  ;;  %v2383_v22 = vadd.f32 %v2349_v24, %v4739_v33 }
 0x704   : > { %v2351_v47 = vpop.permute.xlu0 %2350 }
 0x705   : > { %2415 = vst.msk [vmem:[%s4658_s25 + $0x60] sm:$0xff] %vm2402_vm1, %v2398_v11  ;;  %v2399_v53 = vmax.f32 %v2383_v22, 0.0  ;;  %v2384_v38 = vadd.f32 %v2351_v47, %v4722_v43 }
 0x706   : > { %v2353_v30 = vpop.permute.xlu1 %2352 }
 0x707   : > { %2416 = vst.msk [vmem:[%s4658_s25 + $0x68] sm:$0xff] %vm2402_vm1, %v2399_v53  ;;  %v2400_v19 = vmax.f32 %v2384_v38, 0.0  ;;  %v2385_v6 = vadd.f32 %v2353_v30, %v4734_v1 }
 0x709   : > { %2417 = vst.msk [vmem:[%s4658_s25 + $0x70] sm:$0xff] %vm2402_vm1, %v2400_v19  ;;  %v2401_v43 = vmax.f32 %v2385_v6, 0.0 }
 0x70b   : > { %2418 = vst.msk [vmem:[%s4658_s25 + $0x78] sm:$0xff] %vm2402_vm1, %v2401_v43 }
 0x70c   : > { %3316 = shalt.err (!%p3313_p2)
}
 0x70d   : > { %s3317_s12 = scalar_lea.hbm %s4817_s27, 2048  ;;  %s3321_s23 = scalar_lea.hbm %s4871_s4, 4096 }
 0x70e   : > { %p3318_p13 = scmp.ne.s32.totalorder %s4817_s27, %s3317_s12  ;;  %p3322_p4 = scmp.lt.u32.totalorder %s4817_s27, %s4871_s4 }
 0x70f   : > { %p3323_p7 = scmp.lt.u32.totalorder %s3321_s23, %s3317_s12  ;;  %p3325_p11 = scmp.lt.u32.totalorder %s3317_s12, %s4817_s27 }
 0x710   : > { %p3319_p6 = pnand %p3318_p13, %p5106_p0 }
 0x711   : > { %p3324_p8 = por %p3323_p7, %p3322_p4 }
 0x712   : > { %p3320_p10 = pneg %p3319_p6 }
 0x713   : > { %p3326_p1 = por %p3325_p11, %p3324_p8 }
 0x715   : > { %p3327_p3 = pnand %p3326_p1, %p3320_p10 }
 0x717   : > { %3330 = shalt.err (!%p3327_p3)
}
 0x718   : > { %s3387_s25 = smov 128   ;;  %s3388_s7 = smov 8  }
 0x719   : > { %3022 = dma.vmem_to_hbm [thread:$0]  (%p5106_p0), %s4819_s24, 2048, %s4817_s27, %s2420_s19, %s3387_s25, %s3387_s25, %s3388_s7  }
 0x71a PF: > { %s2448_s26 = sand.u32 1, %s3361_s15   ;;  %p5107_p5 = scmp.ne.s32.totalorder %s4929_s22, 0 }
 0x71b   : > { %p5108_p9 = scmp.ge.s32.totalorder %s3373_s18, 2  ;;  %s2449_s28 = scalar_lea.sflag [#allocation4], %s2448_s26 }
 0x71d   : > { %p3036_p12 = pnand %p5108_p9, %p5107_p5 }
 0x71f   : > { %3356 = dma.done.wait (!%p3036_p12), %s2449_s28, 2048  }
 0x720   : > { %3358 = vsyncadd (!%p3036_p12), %s2449_s28, 4294965248  ;;  %p18_p2 = scmp.ge.s32.totalorder %s3524_s11, 4   ;;  %s5109_s15 = smov %s3365_s16 }
 0x721   : > { %s5110_s16 = smov %s3369_s17  ;;  %s5111_s17 = smov %s3533_s14 }
 0x722   : > { %s5112_s18 = smov %s3524_s11  ;;  %20 = sbr.rel (!%p18_p2) target bundleno = 6 (0x6), region = 89 }
 0x729   :  { %2454 = vsyncpa [#allocation3], 1 }
 0x72a   :  { %2456 = vsyncpa [#allocation3 + $0x1], 1 }
 0x72b   :  { %2457 = vsyncpa [#allocation6], 1 }
 0x72c   :  { %2458 = vsyncpa [#allocation4], 1 }
 0x72d   :  { %2460 = vsyncpa [#allocation4 + $0x1], 1 }

</bundles_post_ra>
